<compile_context>
chip_gen: v6e
topology: v6e:2x2x1
jax: 0.10.0
libtpu: 0.0.40
codegen_flags: <defaults>
</compile_context>

<pallas_src>
import functools

import jax
import jax.numpy as jnp
from jax import lax
from jax.experimental import pallas as pl
from jax.experimental.pallas import tpu as pltpu

MODEL_DIM = 32
HEAD_COUNT = 4
FF_HIDDEN = 64
EPS = 1e-5                      # nn.LayerNorm default eps


# ---------------------------------------------------------------------------
# in-kernel building blocks (traced inside the Pallas kernel body)
# ---------------------------------------------------------------------------
def _layer_norm(x, g, b):
    mu = jnp.mean(x, axis=-1, keepdims=True)
    var = jnp.mean(jnp.square(x - mu), axis=-1, keepdims=True)
    return (x - mu) * lax.rsqrt(var + EPS) * g + b


def _mm(act_f32, w_bf16):
    """bf16 MXU matmul with f32 accumulation (weights pre-cast host-side)."""
    return jnp.dot(act_f32.astype(jnp.bfloat16), w_bf16,
                   preferred_element_type=jnp.float32)


def _mha(q, k, v, wo_bf16, bo, head_count, causal):
    """Multi-head attention on per-batch (S, D) activations.

    Per head: score dot (bf16 operands, f32 accum), causal predicate fused as
    jnp.where (no resident additive mask), exact softmax.  Head contexts are
    concatenated (XLU) and pushed through ONE (S,D)x(D,D) output projection.
    The 1/sqrt(dh) scale is already folded into the Q weights/biases.
    """
    seq_q, d_model = q.shape
    seq_kv = k.shape[0]
    dh = d_model // head_count

    allowed = None
    if causal:
        r = lax.broadcasted_iota(jnp.int32, (seq_q, seq_kv), 0)
        c = lax.broadcasted_iota(jnp.int32, (seq_q, seq_kv), 1)
        allowed = c <= r                       # built once, shared by heads

    q16 = q.astype(jnp.bfloat16)
    k16 = k.astype(jnp.bfloat16)
    v16 = v.astype(jnp.bfloat16)

    ctxs = []
    for h in range(head_count):                # static unroll, H is small
        lo, hi = h * dh, (h + 1) * dh
        # scores = qh @ kh^T  (contraction over dh, no explicit transpose)
        s = lax.dot_general(q16[:, lo:hi], k16[:, lo:hi],
                            (((1,), (1,)), ((), ())),
                            preferred_element_type=jnp.float32)   # (S, T) f32
        if causal:
            s = jnp.where(allowed, s, -1e30)
        m = jnp.max(s, axis=-1, keepdims=True)
        e = jnp.exp(s - m)
        p = e / jnp.sum(e, axis=-1, keepdims=True)   # exact divide (f32)
        ctxs.append(jnp.dot(p.astype(jnp.bfloat16), v16[:, lo:hi],
                            preferred_element_type=jnp.float32))  # (S, dh)
    ctx = jnp.concatenate(ctxs, axis=-1)             # (S, D) -- one concat
    return _mm(ctx, wo_bf16) + bo                    # single output projection


# ---------------------------------------------------------------------------
# Pallas kernel: full decoder block for ONE batch element (grid over batch)
# ---------------------------------------------------------------------------
def decoder_block_kernel(
    x_ref, kv_ref,
    w_qkv_s_ref, w_o_s_ref,            # masked self-attention (fused QKV, bf16)
    w_q_c_ref, w_kv_c_ref, w_o_c_ref,  # cross attention (fused KV, bf16)
    w_hid_ref, w_out_ref,              # feed-forward (bf16)
    vec_ref,                           # packed biases + LayerNorm params (f32)
    out_ref,
    *, head_count,
):
    D = x_ref.shape[2]
    F = w_hid_ref.shape[1]

    x = x_ref[0]            # (S, D) f32
    kv = kv_ref[0]          # (T, D) f32
    vecs = vec_ref[...]     # (13, max(3D, F)) f32 -- all small params, one DMA

    # unpack packed vector params (static slices, all starting at lane 0)
    b_qkv_s = vecs[0:1, 0:3 * D]
    b_o_s = vecs[1:2, 0:D]
    ln1_g = vecs[2:3, 0:D]
    ln1_b = vecs[3:4, 0:D]
    b_q_c = vecs[4:5, 0:D]
    b_kv_c = vecs[5:6, 0:2 * D]
    b_o_c = vecs[6:7, 0:D]
    ln2_g = vecs[7:8, 0:D]
    ln2_b = vecs[8:9, 0:D]
    b_hid = vecs[9:10, 0:F]
    b_out = vecs[10:11, 0:D]
    ln3_g = vecs[11:12, 0:D]
    ln3_b = vecs[12:13, 0:D]

    # 1) masked (causal) self-attention + residual + LayerNorm
    qkv = _mm(x, w_qkv_s_ref[...]) + b_qkv_s          # (S, 3D), Q pre-scaled
    h = _mha(qkv[:, 0:D], qkv[:, D:2 * D], qkv[:, 2 * D:3 * D],
             w_o_s_ref[...], b_o_s, head_count, causal=True)
    h = h + x
    h0 = _layer_norm(h, ln1_g, ln1_b)

    # 2) cross (key/value) attention + residual + LayerNorm (fused KV proj)
    q = _mm(h0, w_q_c_ref[...]) + b_q_c               # (S, D), pre-scaled
    kvp = _mm(kv, w_kv_c_ref[...]) + b_kv_c           # (T, 2D)
    h = _mha(q, kvp[:, 0:D], kvp[:, D:2 * D],
             w_o_c_ref[...], b_o_c, head_count, causal=False)
    h = h + h0
    h0 = _layer_norm(h, ln2_g, ln2_b)

    # 3) feed-forward: two Linears, NO nonlinearity (matches reference module)
    h = _mm(h0, w_hid_ref[...]) + b_hid
    h = _mm(h, w_out_ref[...]) + b_out
    h = h + h0
    h = _layer_norm(h, ln3_g, ln3_b)

    out_ref[0] = h.astype(out_ref.dtype)


# ---------------------------------------------------------------------------
# wrapper
# ---------------------------------------------------------------------------
def transformer_decoder_block(x, kv, packed_params, head_count=HEAD_COUNT):
    # TODO(synk): optional input_mask / key_value_mask are not plumbed through
    # (matches forward() with both masks left as None).
    B, S, D = x.shape
    T = kv.shape[1]

    # weights: full blocks, constant block index across the batch grid axis
    # (Pallas does not re-DMA an unchanged block).
    weight_specs = [pl.BlockSpec(p.shape, lambda b: (0, 0)) for p in packed_params]

    return pl.pallas_call(
        functools.partial(decoder_block_kernel, head_count=head_count),
        out_shape=jax.ShapeDtypeStruct((B, S, D), jnp.float32),
        grid=(B,),
        in_specs=[pl.BlockSpec((1, S, D), lambda b: (b, 0, 0)),
                  pl.BlockSpec((1, T, D), lambda b: (b, 0, 0))] + weight_specs,
        out_specs=pl.BlockSpec((1, S, D), lambda b: (b, 0, 0)),
        compiler_params=pltpu.CompilerParams(
            dimension_semantics=("parallel",)),   # v7x: shard batches over TCs
    )(x, kv, *packed_params)


# ---------------------------------------------------------------------------
# host-side parameter construction (raw "PyTorch-like" params) + packing
# ---------------------------------------------------------------------------
def make_raw_params(key, model_dim=MODEL_DIM, ff_hidden=FF_HIDDEN):
    keys = jax.random.split(key, 26)
    ki = iter(keys)

    def lin(fan_in, fan_out):
        # weight stored as (in, out) [pre-transposed vs. PyTorch's (out, in)]
        w = jax.random.normal(next(ki), (fan_in, fan_out), jnp.float32) * 0.05
        b = jax.random.normal(next(ki), (fan_out,), jnp.float32) * 0.02
        return w, b

    def ln():
        g = 1.0 + 0.1 * jax.random.normal(next(ki), (model_dim,), jnp.float32)
        b = 0.1 * jax.random.normal(next(ki), (model_dim,), jnp.float32)
        return g, b

    D, F = model_dim, ff_hidden
    p = {}
    p['m_wq'], p['m_bq'] = lin(D, D)
    p['m_wk'], p['m_bk'] = lin(D, D)
    p['m_wv'], p['m_bv'] = lin(D, D)
    p['m_wo'], p['m_bo'] = lin(D, D)
    p['ln1_g'], p['ln1_b'] = ln()
    p['c_wq'], p['c_bq'] = lin(D, D)
    p['c_wk'], p['c_bk'] = lin(D, D)
    p['c_wv'], p['c_bv'] = lin(D, D)
    p['c_wo'], p['c_bo'] = lin(D, D)
    p['ln2_g'], p['ln2_b'] = ln()
    p['w_hid'], p['b_hid'] = lin(D, F)
    p['w_out'], p['b_out'] = lin(F, D)
    p['ln3_g'], p['ln3_b'] = ln()
    return p


def pack_params(raw, model_dim=MODEL_DIM, ff_hidden=FF_HIDDEN,
                head_count=HEAD_COUNT):
    """Fuse QKV / KV weights, fold the 1/sqrt(dh) softmax scale into the Q
    weights/biases (one-time host-side transform), cast matmul weights to
    bf16, and pack every small vector param into one f32 array."""
    D = model_dim
    dh = D // head_count
    q_scale = 1.0 / float(dh) ** 0.5
    width = max(3 * D, ff_hidden)

    def row(*parts):
        v = jnp.concatenate([jnp.asarray(p, jnp.float32).reshape(-1)
                             for p in parts])
        return jnp.pad(v, (0, width - v.shape[0]))

    w_qkv_s = jnp.concatenate(
        [raw['m_wq'] * q_scale, raw['m_wk'], raw['m_wv']], axis=1)  # (D, 3D)
    w_kv_c = jnp.concatenate([raw['c_wk'], raw['c_wv']], axis=1)    # (D, 2D)

    vecs = jnp.stack([
        row(raw['m_bq'] * q_scale, raw['m_bk'], raw['m_bv']),  # 0: fused QKV bias
        row(raw['m_bo']),                                      # 1
        row(raw['ln1_g']),                                     # 2
        row(raw['ln1_b']),                                     # 3
        row(raw['c_bq'] * q_scale),                            # 4
        row(raw['c_bk'], raw['c_bv']),                         # 5: fused KV bias
        row(raw['c_bo']),                                      # 6
        row(raw['ln2_g']),                                     # 7
        row(raw['ln2_b']),                                     # 8
        row(raw['b_hid']),                                     # 9
        row(raw['b_out']),                                     # 10
        row(raw['ln3_g']),                                     # 11
        row(raw['ln3_b']),                                     # 12
    ], axis=0).astype(jnp.float32)

    def bf(w):
        return jnp.asarray(w, jnp.float32).astype(jnp.bfloat16)

    return (bf(w_qkv_s), bf(raw['m_wo']),
            bf(raw['c_wq'] * q_scale), bf(w_kv_c), bf(raw['c_wo']),
            bf(raw['w_hid']), bf(raw['w_out']),
            vecs)


# ---------------------------------------------------------------------------
# pure-JAX reference (unfused, per-batch, per-head, f32) for correctness check
# ---------------------------------------------------------------------------
def _ref_layer_norm(x, g, b):
    mu = jnp.mean(x, axis=-1, keepdims=True)
    var = jnp.mean(jnp.square(x - mu), axis=-1, keepdims=True)
    return (x - mu) / jnp.sqrt(var + EPS) * g + b


def _ref_mha(x_q, x_kv, wq, bq, wk, bk, wv, bv, wo, bo, head_count, causal):
    S, D = x_q.shape
    T = x_kv.shape[0]
    dh = D // head_count
    q = x_q @ wq + bq
    k = x_kv @ wk + bk
    v = x_kv @ wv + bv
    outs = []
    for h in range(head_count):
        qh = q[:, h * dh:(h + 1) * dh]
        kh = k[:, h * dh:(h + 1) * dh]
        vh = v[:, h * dh:(h + 1) * dh]
        s = (qh @ kh.T) / (dh ** 0.5)
        if causal:
            s = jnp.where(jnp.arange(T)[None, :] <= jnp.arange(S)[:, None],
                          s, -1e30)
        p = jax.nn.softmax(s, axis=-1)
        outs.append(p @ vh)
    return jnp.concatenate(outs, axis=-1) @ wo + bo


def _ref_block(x, kv, raw, head_count=HEAD_COUNT):
    def one(xb, kvb):
        h = _ref_mha(xb, xb, raw['m_wq'], raw['m_bq'], raw['m_wk'], raw['m_bk'],
                     raw['m_wv'], raw['m_bv'], raw['m_wo'], raw['m_bo'],
                     head_count, causal=True)
        h = h + xb
        h0 = _ref_layer_norm(h, raw['ln1_g'], raw['ln1_b'])
        h = _ref_mha(h0, kvb, raw['c_wq'], raw['c_bq'], raw['c_wk'], raw['c_bk'],
                     raw['c_wv'], raw['c_bv'], raw['c_wo'], raw['c_bo'],
                     head_count, causal=False)
        h = h + h0
        h0 = _ref_layer_norm(h, raw['ln2_g'], raw['ln2_b'])
        h = h0 @ raw['w_hid'] + raw['b_hid']
        h = h @ raw['w_out'] + raw['b_out']
        h = h + h0
        return _ref_layer_norm(h, raw['ln3_g'], raw['ln3_b'])
    return jax.vmap(one)(x, kv)


if __name__ == "__main__":
    B, S, T, D = 2, 8, 8, MODEL_DIM

    key = jax.random.PRNGKey(0)
    kx, kkv, kp = jax.random.split(key, 3)
    x = jax.random.normal(kx, (B, S, D), jnp.float32)
    kv = jax.random.normal(kkv, (B, T, D), jnp.float32)

    raw = make_raw_params(kp)
    params = pack_params(raw)

    out = jax.block_until_ready(transformer_decoder_block(x, kv, params))
    ref = jax.block_until_ready(_ref_block(x, kv, raw))

    assert out.shape == (B, S, D)
    max_err = float(jnp.max(jnp.abs(out - ref)))
    # tolerance reflects bf16 MXU operands (weights + activations) vs the f32
    # reference; softmax/LayerNorm math is f32 and the divide is exact.
    assert jnp.allclose(out, ref, atol=5e-2, rtol=5e-2), f"mismatch: {max_err}"

    print("KERNEL_OK")
</pallas_src>

<mosaic_0001>
module attributes {stable_mosaic.version = 11 : i64} {
  func.func @decoder_block_kernel(%arg0: i32, %arg1: memref<1x8x32xf32, #tpu.memory_space<vmem>>, %arg2: memref<1x8x32xf32, #tpu.memory_space<vmem>>, %arg3: memref<32x96xbf16, #tpu.memory_space<vmem>>, %arg4: memref<32x32xbf16, #tpu.memory_space<vmem>>, %arg5: memref<32x32xbf16, #tpu.memory_space<vmem>>, %arg6: memref<32x64xbf16, #tpu.memory_space<vmem>>, %arg7: memref<32x32xbf16, #tpu.memory_space<vmem>>, %arg8: memref<32x64xbf16, #tpu.memory_space<vmem>>, %arg9: memref<64x32xbf16, #tpu.memory_space<vmem>>, %arg10: memref<13x96xf32, #tpu.memory_space<vmem>>, %arg11: memref<1x8x32xf32, #tpu.memory_space<vmem>>) attributes {dimension_semantics = [#tpu.dimension_semantics<parallel>], iteration_bounds = array<i64: 2>, scalar_prefetch = 0 : i64, scratch_operands = 0 : i64, tpu.core_type = #tpu.core_type<tc>, window_params = [{transform_indices = @transform_0, window_bounds = array<i64: 1, 8, 32>}, {transform_indices = @transform_1, window_bounds = array<i64: 1, 8, 32>}, {pipeline_mode = #tpu.pipeline_mode<synchronous>, transform_indices = @transform_2, window_bounds = array<i64: 32, 96>}, {pipeline_mode = #tpu.pipeline_mode<synchronous>, transform_indices = @transform_3, window_bounds = array<i64: 32, 32>}, {pipeline_mode = #tpu.pipeline_mode<synchronous>, transform_indices = @transform_4, window_bounds = array<i64: 32, 32>}, {pipeline_mode = #tpu.pipeline_mode<synchronous>, transform_indices = @transform_5, window_bounds = array<i64: 32, 64>}, {pipeline_mode = #tpu.pipeline_mode<synchronous>, transform_indices = @transform_6, window_bounds = array<i64: 32, 32>}, {pipeline_mode = #tpu.pipeline_mode<synchronous>, transform_indices = @transform_7, window_bounds = array<i64: 32, 64>}, {pipeline_mode = #tpu.pipeline_mode<synchronous>, transform_indices = @transform_8, window_bounds = array<i64: 64, 32>}, {pipeline_mode = #tpu.pipeline_mode<synchronous>, transform_indices = @transform_9, window_bounds = array<i64: 13, 96>}, {transform_indices = @transform_10, window_bounds = array<i64: 1, 8, 32>}]} {
    %c0 = arith.constant 0 : index
    %c0_0 = arith.constant 0 : index
    %c0_1 = arith.constant 0 : index
    %0 = vector.load %arg1[%c0, %c0_0, %c0_1] : memref<1x8x32xf32, #tpu.memory_space<vmem>>, vector<1x8x32xf32>
    %1 = vector.shape_cast %0 : vector<1x8x32xf32> to vector<8x32xf32>
    %c0_2 = arith.constant 0 : index
    %c0_3 = arith.constant 0 : index
    %c0_4 = arith.constant 0 : index
    %2 = vector.load %arg2[%c0_2, %c0_3, %c0_4] : memref<1x8x32xf32, #tpu.memory_space<vmem>>, vector<1x8x32xf32>
    %3 = vector.shape_cast %2 : vector<1x8x32xf32> to vector<8x32xf32>
    %c0_5 = arith.constant 0 : index
    %c0_6 = arith.constant 0 : index
    %4 = vector.load %arg10[%c0_5, %c0_6] : memref<13x96xf32, #tpu.memory_space<vmem>>, vector<13x96xf32>
    %5 = vector.extract_strided_slice %4 {offsets = [0, 0], sizes = [1, 96], strides = [1, 1]} : vector<13x96xf32> to vector<1x96xf32>
    %6 = vector.extract_strided_slice %4 {offsets = [1, 0], sizes = [1, 32], strides = [1, 1]} : vector<13x96xf32> to vector<1x32xf32>
    %7 = vector.extract_strided_slice %4 {offsets = [2, 0], sizes = [1, 32], strides = [1, 1]} : vector<13x96xf32> to vector<1x32xf32>
    %8 = vector.extract_strided_slice %4 {offsets = [3, 0], sizes = [1, 32], strides = [1, 1]} : vector<13x96xf32> to vector<1x32xf32>
    %9 = vector.extract_strided_slice %4 {offsets = [4, 0], sizes = [1, 32], strides = [1, 1]} : vector<13x96xf32> to vector<1x32xf32>
    %10 = vector.extract_strided_slice %4 {offsets = [5, 0], sizes = [1, 64], strides = [1, 1]} : vector<13x96xf32> to vector<1x64xf32>
    %11 = vector.extract_strided_slice %4 {offsets = [6, 0], sizes = [1, 32], strides = [1, 1]} : vector<13x96xf32> to vector<1x32xf32>
    %12 = vector.extract_strided_slice %4 {offsets = [7, 0], sizes = [1, 32], strides = [1, 1]} : vector<13x96xf32> to vector<1x32xf32>
    %13 = vector.extract_strided_slice %4 {offsets = [8, 0], sizes = [1, 32], strides = [1, 1]} : vector<13x96xf32> to vector<1x32xf32>
    %14 = vector.extract_strided_slice %4 {offsets = [9, 0], sizes = [1, 64], strides = [1, 1]} : vector<13x96xf32> to vector<1x64xf32>
    %15 = vector.extract_strided_slice %4 {offsets = [10, 0], sizes = [1, 32], strides = [1, 1]} : vector<13x96xf32> to vector<1x32xf32>
    %16 = vector.extract_strided_slice %4 {offsets = [11, 0], sizes = [1, 32], strides = [1, 1]} : vector<13x96xf32> to vector<1x32xf32>
    %17 = vector.extract_strided_slice %4 {offsets = [12, 0], sizes = [1, 32], strides = [1, 1]} : vector<13x96xf32> to vector<1x32xf32>
    %c0_7 = arith.constant 0 : index
    %c0_8 = arith.constant 0 : index
    %18 = vector.load %arg3[%c0_7, %c0_8] : memref<32x96xbf16, #tpu.memory_space<vmem>>, vector<32x96xbf16>
    %19 = arith.truncf %1 : vector<8x32xf32> to vector<8x32xbf16>
    %cst = arith.constant dense<0.000000e+00> : vector<8x96xf32>
    %20 = tpu.matmul %19, %18, %cst {dimension_numbers = #tpu.dot_dimension_numbers<[1], [0], [0], [1], [0, 0, 1, 1], [], []>} : vector<8x32xbf16>, vector<32x96xbf16>, vector<8x96xf32> -> vector<8x96xf32>
    %21 = vector.broadcast %5 : vector<1x96xf32> to vector<8x96xf32>
    %22 = arith.addf %20, %21 : vector<8x96xf32>
    %23 = vector.extract_strided_slice %22 {offsets = [0, 0], sizes = [8, 32], strides = [1, 1]} : vector<8x96xf32> to vector<8x32xf32>
    %24 = vector.extract_strided_slice %22 {offsets = [0, 32], sizes = [8, 32], strides = [1, 1]} : vector<8x96xf32> to vector<8x32xf32>
    %25 = vector.extract_strided_slice %22 {offsets = [0, 64], sizes = [8, 32], strides = [1, 1]} : vector<8x96xf32> to vector<8x32xf32>
    %c0_9 = arith.constant 0 : index
    %c0_10 = arith.constant 0 : index
    %26 = vector.load %arg4[%c0_9, %c0_10] : memref<32x32xbf16, #tpu.memory_space<vmem>>, vector<32x32xbf16>
    %27 = tpu.iota {dimensions = array<i32: 0>} : vector<8x8xi32>
    %28 = tpu.iota {dimensions = array<i32: 1>} : vector<8x8xi32>
    %29 = arith.cmpi sle, %28, %27 : vector<8x8xi32>
    %30 = arith.truncf %23 : vector<8x32xf32> to vector<8x32xbf16>
    %31 = arith.truncf %24 : vector<8x32xf32> to vector<8x32xbf16>
    %32 = arith.truncf %25 : vector<8x32xf32> to vector<8x32xbf16>
    %33 = vector.extract_strided_slice %30 {offsets = [0, 0], sizes = [8, 8], strides = [1, 1]} : vector<8x32xbf16> to vector<8x8xbf16>
    %34 = vector.extract_strided_slice %31 {offsets = [0, 0], sizes = [8, 8], strides = [1, 1]} : vector<8x32xbf16> to vector<8x8xbf16>
    %cst_11 = arith.constant dense<0.000000e+00> : vector<8x8xf32>
    %35 = tpu.matmul %33, %34, %cst_11 {dimension_numbers = #tpu.dot_dimension_numbers<[1], [1], [0], [0], [0, 0, 1, 0], [], []>} : vector<8x8xbf16>, vector<8x8xbf16>, vector<8x8xf32> -> vector<8x8xf32>
    %cst_12 = arith.constant -1.000000e+30 : f32
    %36 = vector.broadcast %cst_12 : f32 to vector<8x8xf32>
    %37 = arith.select %29, %35, %36 : vector<8x8xi1>, vector<8x8xf32>
    %cst_13 = arith.constant dense<0xFF800000> : vector<8xf32>
    %38 = vector.multi_reduction <maximumf>, %37, %cst_13 [1] : vector<8x8xf32> to vector<8xf32>
    %39 = vector.shape_cast %38 : vector<8xf32> to vector<8x1xf32>
    %40 = vector.broadcast %39 : vector<8x1xf32> to vector<8x8xf32>
    %41 = arith.subf %37, %40 : vector<8x8xf32>
    %42 = math.exp %41 : vector<8x8xf32>
    %cst_14 = arith.constant dense<0.000000e+00> : vector<8xf32>
    %43 = vector.multi_reduction <add>, %42, %cst_14 [1] : vector<8x8xf32> to vector<8xf32>
    %44 = vector.shape_cast %43 : vector<8xf32> to vector<8x1xf32>
    %45 = vector.broadcast %44 : vector<8x1xf32> to vector<8x8xf32>
    %46 = arith.divf %42, %45 : vector<8x8xf32>
    %47 = arith.truncf %46 : vector<8x8xf32> to vector<8x8xbf16>
    %48 = vector.extract_strided_slice %32 {offsets = [0, 0], sizes = [8, 8], strides = [1, 1]} : vector<8x32xbf16> to vector<8x8xbf16>
    %cst_15 = arith.constant dense<0.000000e+00> : vector<8x8xf32>
    %49 = tpu.matmul %47, %48, %cst_15 {dimension_numbers = #tpu.dot_dimension_numbers<[1], [0], [0], [1], [0, 0, 1, 1], [], []>} : vector<8x8xbf16>, vector<8x8xbf16>, vector<8x8xf32> -> vector<8x8xf32>
    %50 = vector.extract_strided_slice %30 {offsets = [0, 8], sizes = [8, 8], strides = [1, 1]} : vector<8x32xbf16> to vector<8x8xbf16>
    %51 = vector.extract_strided_slice %31 {offsets = [0, 8], sizes = [8, 8], strides = [1, 1]} : vector<8x32xbf16> to vector<8x8xbf16>
    %cst_16 = arith.constant dense<0.000000e+00> : vector<8x8xf32>
    %52 = tpu.matmul %50, %51, %cst_16 {dimension_numbers = #tpu.dot_dimension_numbers<[1], [1], [0], [0], [0, 0, 1, 0], [], []>} : vector<8x8xbf16>, vector<8x8xbf16>, vector<8x8xf32> -> vector<8x8xf32>
    %cst_17 = arith.constant -1.000000e+30 : f32
    %53 = vector.broadcast %cst_17 : f32 to vector<8x8xf32>
    %54 = arith.select %29, %52, %53 : vector<8x8xi1>, vector<8x8xf32>
    %cst_18 = arith.constant dense<0xFF800000> : vector<8xf32>
    %55 = vector.multi_reduction <maximumf>, %54, %cst_18 [1] : vector<8x8xf32> to vector<8xf32>
    %56 = vector.shape_cast %55 : vector<8xf32> to vector<8x1xf32>
    %57 = vector.broadcast %56 : vector<8x1xf32> to vector<8x8xf32>
    %58 = arith.subf %54, %57 : vector<8x8xf32>
    %59 = math.exp %58 : vector<8x8xf32>
    %cst_19 = arith.constant dense<0.000000e+00> : vector<8xf32>
    %60 = vector.multi_reduction <add>, %59, %cst_19 [1] : vector<8x8xf32> to vector<8xf32>
    %61 = vector.shape_cast %60 : vector<8xf32> to vector<8x1xf32>
    %62 = vector.broadcast %61 : vector<8x1xf32> to vector<8x8xf32>
    %63 = arith.divf %59, %62 : vector<8x8xf32>
    %64 = arith.truncf %63 : vector<8x8xf32> to vector<8x8xbf16>
    %65 = vector.extract_strided_slice %32 {offsets = [0, 8], sizes = [8, 8], strides = [1, 1]} : vector<8x32xbf16> to vector<8x8xbf16>
    %cst_20 = arith.constant dense<0.000000e+00> : vector<8x8xf32>
    %66 = tpu.matmul %64, %65, %cst_20 {dimension_numbers = #tpu.dot_dimension_numbers<[1], [0], [0], [1], [0, 0, 1, 1], [], []>} : vector<8x8xbf16>, vector<8x8xbf16>, vector<8x8xf32> -> vector<8x8xf32>
    %67 = vector.extract_strided_slice %30 {offsets = [0, 16], sizes = [8, 8], strides = [1, 1]} : vector<8x32xbf16> to vector<8x8xbf16>
    %68 = vector.extract_strided_slice %31 {offsets = [0, 16], sizes = [8, 8], strides = [1, 1]} : vector<8x32xbf16> to vector<8x8xbf16>
    %cst_21 = arith.constant dense<0.000000e+00> : vector<8x8xf32>
    %69 = tpu.matmul %67, %68, %cst_21 {dimension_numbers = #tpu.dot_dimension_numbers<[1], [1], [0], [0], [0, 0, 1, 0], [], []>} : vector<8x8xbf16>, vector<8x8xbf16>, vector<8x8xf32> -> vector<8x8xf32>
    %cst_22 = arith.constant -1.000000e+30 : f32
    %70 = vector.broadcast %cst_22 : f32 to vector<8x8xf32>
    %71 = arith.select %29, %69, %70 : vector<8x8xi1>, vector<8x8xf32>
    %cst_23 = arith.constant dense<0xFF800000> : vector<8xf32>
    %72 = vector.multi_reduction <maximumf>, %71, %cst_23 [1] : vector<8x8xf32> to vector<8xf32>
    %73 = vector.shape_cast %72 : vector<8xf32> to vector<8x1xf32>
    %74 = vector.broadcast %73 : vector<8x1xf32> to vector<8x8xf32>
    %75 = arith.subf %71, %74 : vector<8x8xf32>
    %76 = math.exp %75 : vector<8x8xf32>
    %cst_24 = arith.constant dense<0.000000e+00> : vector<8xf32>
    %77 = vector.multi_reduction <add>, %76, %cst_24 [1] : vector<8x8xf32> to vector<8xf32>
    %78 = vector.shape_cast %77 : vector<8xf32> to vector<8x1xf32>
    %79 = vector.broadcast %78 : vector<8x1xf32> to vector<8x8xf32>
    %80 = arith.divf %76, %79 : vector<8x8xf32>
    %81 = arith.truncf %80 : vector<8x8xf32> to vector<8x8xbf16>
    %82 = vector.extract_strided_slice %32 {offsets = [0, 16], sizes = [8, 8], strides = [1, 1]} : vector<8x32xbf16> to vector<8x8xbf16>
    %cst_25 = arith.constant dense<0.000000e+00> : vector<8x8xf32>
    %83 = tpu.matmul %81, %82, %cst_25 {dimension_numbers = #tpu.dot_dimension_numbers<[1], [0], [0], [1], [0, 0, 1, 1], [], []>} : vector<8x8xbf16>, vector<8x8xbf16>, vector<8x8xf32> -> vector<8x8xf32>
    %84 = vector.extract_strided_slice %30 {offsets = [0, 24], sizes = [8, 8], strides = [1, 1]} : vector<8x32xbf16> to vector<8x8xbf16>
    %85 = vector.extract_strided_slice %31 {offsets = [0, 24], sizes = [8, 8], strides = [1, 1]} : vector<8x32xbf16> to vector<8x8xbf16>
    %cst_26 = arith.constant dense<0.000000e+00> : vector<8x8xf32>
    %86 = tpu.matmul %84, %85, %cst_26 {dimension_numbers = #tpu.dot_dimension_numbers<[1], [1], [0], [0], [0, 0, 1, 0], [], []>} : vector<8x8xbf16>, vector<8x8xbf16>, vector<8x8xf32> -> vector<8x8xf32>
    %cst_27 = arith.constant -1.000000e+30 : f32
    %87 = vector.broadcast %cst_27 : f32 to vector<8x8xf32>
    %88 = arith.select %29, %86, %87 : vector<8x8xi1>, vector<8x8xf32>
    %cst_28 = arith.constant dense<0xFF800000> : vector<8xf32>
    %89 = vector.multi_reduction <maximumf>, %88, %cst_28 [1] : vector<8x8xf32> to vector<8xf32>
    %90 = vector.shape_cast %89 : vector<8xf32> to vector<8x1xf32>
    %91 = vector.broadcast %90 : vector<8x1xf32> to vector<8x8xf32>
    %92 = arith.subf %88, %91 : vector<8x8xf32>
    %93 = math.exp %92 : vector<8x8xf32>
    %cst_29 = arith.constant dense<0.000000e+00> : vector<8xf32>
    %94 = vector.multi_reduction <add>, %93, %cst_29 [1] : vector<8x8xf32> to vector<8xf32>
    %95 = vector.shape_cast %94 : vector<8xf32> to vector<8x1xf32>
    %96 = vector.broadcast %95 : vector<8x1xf32> to vector<8x8xf32>
    %97 = arith.divf %93, %96 : vector<8x8xf32>
    %98 = arith.truncf %97 : vector<8x8xf32> to vector<8x8xbf16>
    %99 = vector.extract_strided_slice %32 {offsets = [0, 24], sizes = [8, 8], strides = [1, 1]} : vector<8x32xbf16> to vector<8x8xbf16>
    %cst_30 = arith.constant dense<0.000000e+00> : vector<8x8xf32>
    %100 = tpu.matmul %98, %99, %cst_30 {dimension_numbers = #tpu.dot_dimension_numbers<[1], [0], [0], [1], [0, 0, 1, 1], [], []>} : vector<8x8xbf16>, vector<8x8xbf16>, vector<8x8xf32> -> vector<8x8xf32>
    %101 = tpu.concatenate %49, %66, %83, %100 in 1 : vector<8x8xf32>, vector<8x8xf32>, vector<8x8xf32>, vector<8x8xf32> -> vector<8x32xf32>
    %102 = arith.truncf %101 : vector<8x32xf32> to vector<8x32xbf16>
    %cst_31 = arith.constant dense<0.000000e+00> : vector<8x32xf32>
    %103 = tpu.matmul %102, %26, %cst_31 {dimension_numbers = #tpu.dot_dimension_numbers<[1], [0], [0], [1], [0, 0, 1, 1], [], []>} : vector<8x32xbf16>, vector<32x32xbf16>, vector<8x32xf32> -> vector<8x32xf32>
    %104 = vector.broadcast %6 : vector<1x32xf32> to vector<8x32xf32>
    %105 = arith.addf %103, %104 : vector<8x32xf32>
    %106 = arith.addf %105, %1 : vector<8x32xf32>
    %cst_32 = arith.constant dense<0.000000e+00> : vector<8xf32>
    %107 = vector.multi_reduction <add>, %106, %cst_32 [1] : vector<8x32xf32> to vector<8xf32>
    %108 = vector.shape_cast %107 : vector<8xf32> to vector<8x1xf32>
    %cst_33 = arith.constant 3.200000e+01 : f32
    %109 = vector.broadcast %cst_33 : f32 to vector<8x1xf32>
    %110 = arith.divf %108, %109 : vector<8x1xf32>
    %111 = vector.broadcast %110 : vector<8x1xf32> to vector<8x32xf32>
    %112 = arith.subf %106, %111 : vector<8x32xf32>
    %113 = arith.mulf %112, %112 : vector<8x32xf32>
    %cst_34 = arith.constant dense<0.000000e+00> : vector<8xf32>
    %114 = vector.multi_reduction <add>, %113, %cst_34 [1] : vector<8x32xf32> to vector<8xf32>
    %115 = vector.shape_cast %114 : vector<8xf32> to vector<8x1xf32>
    %cst_35 = arith.constant 3.200000e+01 : f32
    %116 = vector.broadcast %cst_35 : f32 to vector<8x1xf32>
    %117 = arith.divf %115, %116 : vector<8x1xf32>
    %118 = vector.broadcast %110 : vector<8x1xf32> to vector<8x32xf32>
    %119 = arith.subf %106, %118 : vector<8x32xf32>
    %cst_36 = arith.constant 9.99999974E-6 : f32
    %120 = vector.broadcast %cst_36 : f32 to vector<8x1xf32>
    %121 = arith.addf %117, %120 : vector<8x1xf32>
    %122 = math.rsqrt %121 : vector<8x1xf32>
    %123 = vector.broadcast %122 : vector<8x1xf32> to vector<8x32xf32>
    %124 = arith.mulf %119, %123 : vector<8x32xf32>
    %125 = vector.broadcast %7 : vector<1x32xf32> to vector<8x32xf32>
    %126 = arith.mulf %124, %125 : vector<8x32xf32>
    %127 = vector.broadcast %8 : vector<1x32xf32> to vector<8x32xf32>
    %128 = arith.addf %126, %127 : vector<8x32xf32>
    %c0_37 = arith.constant 0 : index
    %c0_38 = arith.constant 0 : index
    %129 = vector.load %arg5[%c0_37, %c0_38] : memref<32x32xbf16, #tpu.memory_space<vmem>>, vector<32x32xbf16>
    %130 = arith.truncf %128 : vector<8x32xf32> to vector<8x32xbf16>
    %cst_39 = arith.constant dense<0.000000e+00> : vector<8x32xf32>
    %131 = tpu.matmul %130, %129, %cst_39 {dimension_numbers = #tpu.dot_dimension_numbers<[1], [0], [0], [1], [0, 0, 1, 1], [], []>} : vector<8x32xbf16>, vector<32x32xbf16>, vector<8x32xf32> -> vector<8x32xf32>
    %132 = vector.broadcast %9 : vector<1x32xf32> to vector<8x32xf32>
    %133 = arith.addf %131, %132 : vector<8x32xf32>
    %c0_40 = arith.constant 0 : index
    %c0_41 = arith.constant 0 : index
    %134 = vector.load %arg6[%c0_40, %c0_41] : memref<32x64xbf16, #tpu.memory_space<vmem>>, vector<32x64xbf16>
    %135 = arith.truncf %3 : vector<8x32xf32> to vector<8x32xbf16>
    %cst_42 = arith.constant dense<0.000000e+00> : vector<8x64xf32>
    %136 = tpu.matmul %135, %134, %cst_42 {dimension_numbers = #tpu.dot_dimension_numbers<[1], [0], [0], [1], [0, 0, 1, 1], [], []>} : vector<8x32xbf16>, vector<32x64xbf16>, vector<8x64xf32> -> vector<8x64xf32>
    %137 = vector.broadcast %10 : vector<1x64xf32> to vector<8x64xf32>
    %138 = arith.addf %136, %137 : vector<8x64xf32>
    %139 = vector.extract_strided_slice %138 {offsets = [0, 0], sizes = [8, 32], strides = [1, 1]} : vector<8x64xf32> to vector<8x32xf32>
    %140 = vector.extract_strided_slice %138 {offsets = [0, 32], sizes = [8, 32], strides = [1, 1]} : vector<8x64xf32> to vector<8x32xf32>
    %c0_43 = arith.constant 0 : index
    %c0_44 = arith.constant 0 : index
    %141 = vector.load %arg7[%c0_43, %c0_44] : memref<32x32xbf16, #tpu.memory_space<vmem>>, vector<32x32xbf16>
    %142 = arith.truncf %133 : vector<8x32xf32> to vector<8x32xbf16>
    %143 = arith.truncf %139 : vector<8x32xf32> to vector<8x32xbf16>
    %144 = arith.truncf %140 : vector<8x32xf32> to vector<8x32xbf16>
    %145 = vector.extract_strided_slice %142 {offsets = [0, 0], sizes = [8, 8], strides = [1, 1]} : vector<8x32xbf16> to vector<8x8xbf16>
    %146 = vector.extract_strided_slice %143 {offsets = [0, 0], sizes = [8, 8], strides = [1, 1]} : vector<8x32xbf16> to vector<8x8xbf16>
    %cst_45 = arith.constant dense<0.000000e+00> : vector<8x8xf32>
    %147 = tpu.matmul %145, %146, %cst_45 {dimension_numbers = #tpu.dot_dimension_numbers<[1], [1], [0], [0], [0, 0, 1, 0], [], []>} : vector<8x8xbf16>, vector<8x8xbf16>, vector<8x8xf32> -> vector<8x8xf32>
    %cst_46 = arith.constant dense<0xFF800000> : vector<8xf32>
    %148 = vector.multi_reduction <maximumf>, %147, %cst_46 [1] : vector<8x8xf32> to vector<8xf32>
    %149 = vector.shape_cast %148 : vector<8xf32> to vector<8x1xf32>
    %150 = vector.broadcast %149 : vector<8x1xf32> to vector<8x8xf32>
    %151 = arith.subf %147, %150 : vector<8x8xf32>
    %152 = math.exp %151 : vector<8x8xf32>
    %cst_47 = arith.constant dense<0.000000e+00> : vector<8xf32>
    %153 = vector.multi_reduction <add>, %152, %cst_47 [1] : vector<8x8xf32> to vector<8xf32>
    %154 = vector.shape_cast %153 : vector<8xf32> to vector<8x1xf32>
    %155 = vector.broadcast %154 : vector<8x1xf32> to vector<8x8xf32>
    %156 = arith.divf %152, %155 : vector<8x8xf32>
    %157 = arith.truncf %156 : vector<8x8xf32> to vector<8x8xbf16>
    %158 = vector.extract_strided_slice %144 {offsets = [0, 0], sizes = [8, 8], strides = [1, 1]} : vector<8x32xbf16> to vector<8x8xbf16>
    %cst_48 = arith.constant dense<0.000000e+00> : vector<8x8xf32>
    %159 = tpu.matmul %157, %158, %cst_48 {dimension_numbers = #tpu.dot_dimension_numbers<[1], [0], [0], [1], [0, 0, 1, 1], [], []>} : vector<8x8xbf16>, vector<8x8xbf16>, vector<8x8xf32> -> vector<8x8xf32>
    %160 = vector.extract_strided_slice %142 {offsets = [0, 8], sizes = [8, 8], strides = [1, 1]} : vector<8x32xbf16> to vector<8x8xbf16>
    %161 = vector.extract_strided_slice %143 {offsets = [0, 8], sizes = [8, 8], strides = [1, 1]} : vector<8x32xbf16> to vector<8x8xbf16>
    %cst_49 = arith.constant dense<0.000000e+00> : vector<8x8xf32>
    %162 = tpu.matmul %160, %161, %cst_49 {dimension_numbers = #tpu.dot_dimension_numbers<[1], [1], [0], [0], [0, 0, 1, 0], [], []>} : vector<8x8xbf16>, vector<8x8xbf16>, vector<8x8xf32> -> vector<8x8xf32>
    %cst_50 = arith.constant dense<0xFF800000> : vector<8xf32>
    %163 = vector.multi_reduction <maximumf>, %162, %cst_50 [1] : vector<8x8xf32> to vector<8xf32>
    %164 = vector.shape_cast %163 : vector<8xf32> to vector<8x1xf32>
    %165 = vector.broadcast %164 : vector<8x1xf32> to vector<8x8xf32>
    %166 = arith.subf %162, %165 : vector<8x8xf32>
    %167 = math.exp %166 : vector<8x8xf32>
    %cst_51 = arith.constant dense<0.000000e+00> : vector<8xf32>
    %168 = vector.multi_reduction <add>, %167, %cst_51 [1] : vector<8x8xf32> to vector<8xf32>
    %169 = vector.shape_cast %168 : vector<8xf32> to vector<8x1xf32>
    %170 = vector.broadcast %169 : vector<8x1xf32> to vector<8x8xf32>
    %171 = arith.divf %167, %170 : vector<8x8xf32>
    %172 = arith.truncf %171 : vector<8x8xf32> to vector<8x8xbf16>
    %173 = vector.extract_strided_slice %144 {offsets = [0, 8], sizes = [8, 8], strides = [1, 1]} : vector<8x32xbf16> to vector<8x8xbf16>
    %cst_52 = arith.constant dense<0.000000e+00> : vector<8x8xf32>
    %174 = tpu.matmul %172, %173, %cst_52 {dimension_numbers = #tpu.dot_dimension_numbers<[1], [0], [0], [1], [0, 0, 1, 1], [], []>} : vector<8x8xbf16>, vector<8x8xbf16>, vector<8x8xf32> -> vector<8x8xf32>
    %175 = vector.extract_strided_slice %142 {offsets = [0, 16], sizes = [8, 8], strides = [1, 1]} : vector<8x32xbf16> to vector<8x8xbf16>
    %176 = vector.extract_strided_slice %143 {offsets = [0, 16], sizes = [8, 8], strides = [1, 1]} : vector<8x32xbf16> to vector<8x8xbf16>
    %cst_53 = arith.constant dense<0.000000e+00> : vector<8x8xf32>
    %177 = tpu.matmul %175, %176, %cst_53 {dimension_numbers = #tpu.dot_dimension_numbers<[1], [1], [0], [0], [0, 0, 1, 0], [], []>} : vector<8x8xbf16>, vector<8x8xbf16>, vector<8x8xf32> -> vector<8x8xf32>
    %cst_54 = arith.constant dense<0xFF800000> : vector<8xf32>
    %178 = vector.multi_reduction <maximumf>, %177, %cst_54 [1] : vector<8x8xf32> to vector<8xf32>
    %179 = vector.shape_cast %178 : vector<8xf32> to vector<8x1xf32>
    %180 = vector.broadcast %179 : vector<8x1xf32> to vector<8x8xf32>
    %181 = arith.subf %177, %180 : vector<8x8xf32>
    %182 = math.exp %181 : vector<8x8xf32>
    %cst_55 = arith.constant dense<0.000000e+00> : vector<8xf32>
    %183 = vector.multi_reduction <add>, %182, %cst_55 [1] : vector<8x8xf32> to vector<8xf32>
    %184 = vector.shape_cast %183 : vector<8xf32> to vector<8x1xf32>
    %185 = vector.broadcast %184 : vector<8x1xf32> to vector<8x8xf32>
    %186 = arith.divf %182, %185 : vector<8x8xf32>
    %187 = arith.truncf %186 : vector<8x8xf32> to vector<8x8xbf16>
    %188 = vector.extract_strided_slice %144 {offsets = [0, 16], sizes = [8, 8], strides = [1, 1]} : vector<8x32xbf16> to vector<8x8xbf16>
    %cst_56 = arith.constant dense<0.000000e+00> : vector<8x8xf32>
    %189 = tpu.matmul %187, %188, %cst_56 {dimension_numbers = #tpu.dot_dimension_numbers<[1], [0], [0], [1], [0, 0, 1, 1], [], []>} : vector<8x8xbf16>, vector<8x8xbf16>, vector<8x8xf32> -> vector<8x8xf32>
    %190 = vector.extract_strided_slice %142 {offsets = [0, 24], sizes = [8, 8], strides = [1, 1]} : vector<8x32xbf16> to vector<8x8xbf16>
    %191 = vector.extract_strided_slice %143 {offsets = [0, 24], sizes = [8, 8], strides = [1, 1]} : vector<8x32xbf16> to vector<8x8xbf16>
    %cst_57 = arith.constant dense<0.000000e+00> : vector<8x8xf32>
    %192 = tpu.matmul %190, %191, %cst_57 {dimension_numbers = #tpu.dot_dimension_numbers<[1], [1], [0], [0], [0, 0, 1, 0], [], []>} : vector<8x8xbf16>, vector<8x8xbf16>, vector<8x8xf32> -> vector<8x8xf32>
    %cst_58 = arith.constant dense<0xFF800000> : vector<8xf32>
    %193 = vector.multi_reduction <maximumf>, %192, %cst_58 [1] : vector<8x8xf32> to vector<8xf32>
    %194 = vector.shape_cast %193 : vector<8xf32> to vector<8x1xf32>
    %195 = vector.broadcast %194 : vector<8x1xf32> to vector<8x8xf32>
    %196 = arith.subf %192, %195 : vector<8x8xf32>
    %197 = math.exp %196 : vector<8x8xf32>
    %cst_59 = arith.constant dense<0.000000e+00> : vector<8xf32>
    %198 = vector.multi_reduction <add>, %197, %cst_59 [1] : vector<8x8xf32> to vector<8xf32>
    %199 = vector.shape_cast %198 : vector<8xf32> to vector<8x1xf32>
    %200 = vector.broadcast %199 : vector<8x1xf32> to vector<8x8xf32>
    %201 = arith.divf %197, %200 : vector<8x8xf32>
    %202 = arith.truncf %201 : vector<8x8xf32> to vector<8x8xbf16>
    %203 = vector.extract_strided_slice %144 {offsets = [0, 24], sizes = [8, 8], strides = [1, 1]} : vector<8x32xbf16> to vector<8x8xbf16>
    %cst_60 = arith.constant dense<0.000000e+00> : vector<8x8xf32>
    %204 = tpu.matmul %202, %203, %cst_60 {dimension_numbers = #tpu.dot_dimension_numbers<[1], [0], [0], [1], [0, 0, 1, 1], [], []>} : vector<8x8xbf16>, vector<8x8xbf16>, vector<8x8xf32> -> vector<8x8xf32>
    %205 = tpu.concatenate %159, %174, %189, %204 in 1 : vector<8x8xf32>, vector<8x8xf32>, vector<8x8xf32>, vector<8x8xf32> -> vector<8x32xf32>
    %206 = arith.truncf %205 : vector<8x32xf32> to vector<8x32xbf16>
    %cst_61 = arith.constant dense<0.000000e+00> : vector<8x32xf32>
    %207 = tpu.matmul %206, %141, %cst_61 {dimension_numbers = #tpu.dot_dimension_numbers<[1], [0], [0], [1], [0, 0, 1, 1], [], []>} : vector<8x32xbf16>, vector<32x32xbf16>, vector<8x32xf32> -> vector<8x32xf32>
    %208 = vector.broadcast %11 : vector<1x32xf32> to vector<8x32xf32>
    %209 = arith.addf %207, %208 : vector<8x32xf32>
    %210 = arith.addf %209, %128 : vector<8x32xf32>
    %cst_62 = arith.constant dense<0.000000e+00> : vector<8xf32>
    %211 = vector.multi_reduction <add>, %210, %cst_62 [1] : vector<8x32xf32> to vector<8xf32>
    %212 = vector.shape_cast %211 : vector<8xf32> to vector<8x1xf32>
    %cst_63 = arith.constant 3.200000e+01 : f32
    %213 = vector.broadcast %cst_63 : f32 to vector<8x1xf32>
    %214 = arith.divf %212, %213 : vector<8x1xf32>
    %215 = vector.broadcast %214 : vector<8x1xf32> to vector<8x32xf32>
    %216 = arith.subf %210, %215 : vector<8x32xf32>
    %217 = arith.mulf %216, %216 : vector<8x32xf32>
    %cst_64 = arith.constant dense<0.000000e+00> : vector<8xf32>
    %218 = vector.multi_reduction <add>, %217, %cst_64 [1] : vector<8x32xf32> to vector<8xf32>
    %219 = vector.shape_cast %218 : vector<8xf32> to vector<8x1xf32>
    %cst_65 = arith.constant 3.200000e+01 : f32
    %220 = vector.broadcast %cst_65 : f32 to vector<8x1xf32>
    %221 = arith.divf %219, %220 : vector<8x1xf32>
    %222 = vector.broadcast %214 : vector<8x1xf32> to vector<8x32xf32>
    %223 = arith.subf %210, %222 : vector<8x32xf32>
    %cst_66 = arith.constant 9.99999974E-6 : f32
    %224 = vector.broadcast %cst_66 : f32 to vector<8x1xf32>
    %225 = arith.addf %221, %224 : vector<8x1xf32>
    %226 = math.rsqrt %225 : vector<8x1xf32>
    %227 = vector.broadcast %226 : vector<8x1xf32> to vector<8x32xf32>
    %228 = arith.mulf %223, %227 : vector<8x32xf32>
    %229 = vector.broadcast %12 : vector<1x32xf32> to vector<8x32xf32>
    %230 = arith.mulf %228, %229 : vector<8x32xf32>
    %231 = vector.broadcast %13 : vector<1x32xf32> to vector<8x32xf32>
    %232 = arith.addf %230, %231 : vector<8x32xf32>
    %c0_67 = arith.constant 0 : index
    %c0_68 = arith.constant 0 : index
    %233 = vector.load %arg8[%c0_67, %c0_68] : memref<32x64xbf16, #tpu.memory_space<vmem>>, vector<32x64xbf16>
    %234 = arith.truncf %232 : vector<8x32xf32> to vector<8x32xbf16>
    %cst_69 = arith.constant dense<0.000000e+00> : vector<8x64xf32>
    %235 = tpu.matmul %234, %233, %cst_69 {dimension_numbers = #tpu.dot_dimension_numbers<[1], [0], [0], [1], [0, 0, 1, 1], [], []>} : vector<8x32xbf16>, vector<32x64xbf16>, vector<8x64xf32> -> vector<8x64xf32>
    %236 = vector.broadcast %14 : vector<1x64xf32> to vector<8x64xf32>
    %237 = arith.addf %235, %236 : vector<8x64xf32>
    %c0_70 = arith.constant 0 : index
    %c0_71 = arith.constant 0 : index
    %238 = vector.load %arg9[%c0_70, %c0_71] : memref<64x32xbf16, #tpu.memory_space<vmem>>, vector<64x32xbf16>
    %239 = arith.truncf %237 : vector<8x64xf32> to vector<8x64xbf16>
    %cst_72 = arith.constant dense<0.000000e+00> : vector<8x32xf32>
    %240 = tpu.matmul %239, %238, %cst_72 {dimension_numbers = #tpu.dot_dimension_numbers<[1], [0], [0], [1], [0, 0, 1, 1], [], []>} : vector<8x64xbf16>, vector<64x32xbf16>, vector<8x32xf32> -> vector<8x32xf32>
    %241 = vector.broadcast %15 : vector<1x32xf32> to vector<8x32xf32>
    %242 = arith.addf %240, %241 : vector<8x32xf32>
    %243 = arith.addf %242, %232 : vector<8x32xf32>
    %cst_73 = arith.constant dense<0.000000e+00> : vector<8xf32>
    %244 = vector.multi_reduction <add>, %243, %cst_73 [1] : vector<8x32xf32> to vector<8xf32>
    %245 = vector.shape_cast %244 : vector<8xf32> to vector<8x1xf32>
    %cst_74 = arith.constant 3.200000e+01 : f32
    %246 = vector.broadcast %cst_74 : f32 to vector<8x1xf32>
    %247 = arith.divf %245, %246 : vector<8x1xf32>
    %248 = vector.broadcast %247 : vector<8x1xf32> to vector<8x32xf32>
    %249 = arith.subf %243, %248 : vector<8x32xf32>
    %250 = arith.mulf %249, %249 : vector<8x32xf32>
    %cst_75 = arith.constant dense<0.000000e+00> : vector<8xf32>
    %251 = vector.multi_reduction <add>, %250, %cst_75 [1] : vector<8x32xf32> to vector<8xf32>
    %252 = vector.shape_cast %251 : vector<8xf32> to vector<8x1xf32>
    %cst_76 = arith.constant 3.200000e+01 : f32
    %253 = vector.broadcast %cst_76 : f32 to vector<8x1xf32>
    %254 = arith.divf %252, %253 : vector<8x1xf32>
    %255 = vector.broadcast %247 : vector<8x1xf32> to vector<8x32xf32>
    %256 = arith.subf %243, %255 : vector<8x32xf32>
    %cst_77 = arith.constant 9.99999974E-6 : f32
    %257 = vector.broadcast %cst_77 : f32 to vector<8x1xf32>
    %258 = arith.addf %254, %257 : vector<8x1xf32>
    %259 = math.rsqrt %258 : vector<8x1xf32>
    %260 = vector.broadcast %259 : vector<8x1xf32> to vector<8x32xf32>
    %261 = arith.mulf %256, %260 : vector<8x32xf32>
    %262 = vector.broadcast %16 : vector<1x32xf32> to vector<8x32xf32>
    %263 = arith.mulf %261, %262 : vector<8x32xf32>
    %264 = vector.broadcast %17 : vector<1x32xf32> to vector<8x32xf32>
    %265 = arith.addf %263, %264 : vector<8x32xf32>
    %c0_78 = arith.constant 0 : index
    %c0_79 = arith.constant 0 : index
    %c0_80 = arith.constant 0 : index
    %266 = vector.load %arg11[%c0_78, %c0_79, %c0_80] : memref<1x8x32xf32, #tpu.memory_space<vmem>>, vector<1x8x32xf32>
    %267 = vector.shape_cast %266 : vector<1x8x32xf32> to vector<8x32xf32>
    %268 = vector.shape_cast %265 : vector<8x32xf32> to vector<1x8x32xf32>
    tpu.vector_store %arg11[%c0_78, %c0_79, %c0_80], %268 {strides = array<i32>} : memref<1x8x32xf32, #tpu.memory_space<vmem>>, vector<1x8x32xf32>,
    return
  }
  func.func @transform_0(%arg0: i32) -> (i32, i32, i32) {
    %c0_i32 = arith.constant 0 : i32
    %c0_i32_0 = arith.constant 0 : i32
    %c0_i32_1 = arith.constant 0 : i32
    return %arg0, %c0_i32, %c0_i32_0 : i32, i32, i32
  }
  func.func @transform_1(%arg0: i32) -> (i32, i32, i32) {
    %c0_i32 = arith.constant 0 : i32
    %c0_i32_0 = arith.constant 0 : i32
    %c0_i32_1 = arith.constant 0 : i32
    return %arg0, %c0_i32, %c0_i32_0 : i32, i32, i32
  }
  func.func @transform_2(%arg0: i32) -> (i32, i32) {
    %c0_i32 = arith.constant 0 : i32
    %c0_i32_0 = arith.constant 0 : i32
    %c0_i32_1 = arith.constant 0 : i32
    return %c0_i32, %c0_i32_0 : i32, i32
  }
  func.func @transform_3(%arg0: i32) -> (i32, i32) {
    %c0_i32 = arith.constant 0 : i32
    %c0_i32_0 = arith.constant 0 : i32
    %c0_i32_1 = arith.constant 0 : i32
    return %c0_i32, %c0_i32_0 : i32, i32
  }
  func.func @transform_4(%arg0: i32) -> (i32, i32) {
    %c0_i32 = arith.constant 0 : i32
    %c0_i32_0 = arith.constant 0 : i32
    %c0_i32_1 = arith.constant 0 : i32
    return %c0_i32, %c0_i32_0 : i32, i32
  }
  func.func @transform_5(%arg0: i32) -> (i32, i32) {
    %c0_i32 = arith.constant 0 : i32
    %c0_i32_0 = arith.constant 0 : i32
    %c0_i32_1 = arith.constant 0 : i32
    return %c0_i32, %c0_i32_0 : i32, i32
  }
  func.func @transform_6(%arg0: i32) -> (i32, i32) {
    %c0_i32 = arith.constant 0 : i32
    %c0_i32_0 = arith.constant 0 : i32
    %c0_i32_1 = arith.constant 0 : i32
    return %c0_i32, %c0_i32_0 : i32, i32
  }
  func.func @transform_7(%arg0: i32) -> (i32, i32) {
    %c0_i32 = arith.constant 0 : i32
    %c0_i32_0 = arith.constant 0 : i32
    %c0_i32_1 = arith.constant 0 : i32
    return %c0_i32, %c0_i32_0 : i32, i32
  }
  func.func @transform_8(%arg0: i32) -> (i32, i32) {
    %c0_i32 = arith.constant 0 : i32
    %c0_i32_0 = arith.constant 0 : i32
    %c0_i32_1 = arith.constant 0 : i32
    return %c0_i32, %c0_i32_0 : i32, i32
  }
  func.func @transform_9(%arg0: i32) -> (i32, i32) {
    %c0_i32 = arith.constant 0 : i32
    %c0_i32_0 = arith.constant 0 : i32
    %c0_i32_1 = arith.constant 0 : i32
    return %c0_i32, %c0_i32_0 : i32, i32
  }
  func.func @transform_10(%arg0: i32) -> (i32, i32, i32) {
    %c0_i32 = arith.constant 0 : i32
    %c0_i32_0 = arith.constant 0 : i32
    %c0_i32_1 = arith.constant 0 : i32
    return %arg0, %c0_i32, %c0_i32_0 : i32, i32, i32
  }
}

</mosaic_0001>

<bundles_post_ra>
// kernel: tpu_custom_call.1
= control target key start
LH: loop header
LB: loop body
LE: loop exit
PB: predicated region body
PF: predicated region fallthrough
CT: control target
= control target key end

     0   :  { %s3219_s0 = inlined_call_operand.vmem [shape: f32[2,8,32], index: 0, kind: input, shape index: {}]   ;;  %s3220_s1 = inlined_call_operand.vmem [shape: f32[2,8,32], index: 1, kind: input, shape index: {}]   ;;  %s3221_s2 = inlined_call_operand.vmem [shape: bf16[32,96], index: 2, kind: input, shape index: {}]   ;;  %s3222_s3 = inlined_call_operand.hbm [shape: bf16[32,32], index: 3, kind: input, shape index: {}]   ;;  %s3223_s4 = inlined_call_operand.hbm [shape: bf16[32,32], index: 4, kind: input, shape index: {}]   ;;  %s3224_s5 = inlined_call_operand.hbm [shape: bf16[32,64], index: 5, kind: input, shape index: {}]   ;;  %s3225_s6 = inlined_call_operand.hbm [shape: bf16[32,32], index: 6, kind: input, shape index: {}]   ;;  %s3226_s7 = inlined_call_operand.hbm [shape: bf16[32,64], index: 7, kind: input, shape index: {}]   ;;  %s3227_s8 = inlined_call_operand.vmem [shape: bf16[64,32], index: 8, kind: input, shape index: {}]   ;;  %s3228_s9 = inlined_call_operand.vmem [shape: f32[13,96], index: 9, kind: input, shape index: {}]   ;;  %s3229_s10 = inlined_call_operand.hbm [shape: f32[2,8,32], index: 10, kind: output, shape index: {}]  }
   0x1   :  { %3233 = sst [smem:[#allocation18_spill]] %s3223_s4 }
   0x2   :  { %15 = vsyncpa [#allocation3], 0 }
   0x3   :  { %16 = vsyncpa [#allocation6], 0 }
   0x4   :  { %17 = vsyncpa [#allocation9], 0 }
   0x5   :  { %18 = vsyncpa [#allocation4], 0 }
   0x6   :  { %20 = vsyncpa [#allocation4 + $0x1], 0  ;;  %s2764_s13 = smov 0   ;;  %s2766_s14 = smov 0  }
   0x7   :  { %s2768_s15 = smov 0   ;;  %s2770_s16 = smov 0  }
   0x8 LB: > { %3234 = sst [smem:[#allocation16_spill]] %s2679_s15  ;;  %s2785_s17 = sadd.s32 4294967295, %s2683_s16   ;;  %s2683_s16 = sphi %s2770_s16, %s3253_s16   ;;  %s2679_s15 = sphi %s2768_s15, %s3250_s15   ;;  %s2675_s14 = sphi %s2766_s14, %s3252_s14   ;;  %s2671_s13 = sphi %s2764_s13, %s3251_s13  }
   0x9   : > { %s2048_s18 = sadd.s32 4294967294, %s2683_s16   ;;  %s2789_s19 = sadd.s32 1, %s2683_s16  }
   0xa   : > { %s253_s20 = sadd.s32 1, %s2679_s15  ;;  %s250_s21 = ssub.s32 %s2683_s16, %s2789_s19 }
   0xb   : > { %p263_p0 = scmp.ne.s32.totalorder %s2679_s15, %s2675_s14  ;;  %p251_p1 = scmp.eq.s32.totalorder %s250_s21, 0 }
   0xc   : > { %p264_p2 = scmp.eq.s32.totalorder %s2785_s17, 1  ;;  %p269_p3 = scmp.ne.s32.totalorder %s2675_s14, %s2671_s13 }
   0xd   : > { %p270_p4 = scmp.eq.s32.totalorder %s2048_s18, 1  ;;  %p2049_p7 = scmp.ge.s32.totalorder %s2683_s16, 1 }
   0xe   : > { %s2800_s22 = scalar_select %p251_p1, %s2679_s15, %s253_s20  }
   0xf   : > { %p2802_p5 = por %p264_p2, %p263_p0  ;;  %p2806_p6 = por %p270_p4, %p269_p3 }
  0x10   : > { %3235 = sst [smem:[#allocation17_spill]] %s2800_s22  ;;  %p277_p8 = scmp.lt.s32.totalorder %s2683_s16, 3 }
  0x11   : > { %p3231_p9 = scmp.eq.s32.totalorder %s2785_s17, 0  ;;  %s2685_s26 = smov [#allocation5]  }
  0x12   : > { %p2813_p10 = pnand %p2049_p7, %p277_p8  ;;  %s305_s27 = sshll.u32 %s2685_s26, 4  ;;  %s306_s27 = int_to_ptr.vmem [resolvable:$true] %s305_s27 }
  0x13   : > { %s2686_s29 = smov [#allocation8]   ;;  %s2687_s11 = smov [#allocation2]  }
  0x14   : > { %p2341_p11 = pneg %p2813_p10  ;;  %s331_s30 = sshll.u32 %s2686_s29, 4  ;;  %s332_s30 = int_to_ptr.vmem [resolvable:$true] %s331_s30 }
  0x15   : > { %s292_s12 = sshll.u32 %s2687_s11, 4  ;;  %s2492_s20 = scalar_lea.vmem %s306_s27, 256  ;;  %s293_s12 = int_to_ptr.vmem [resolvable:$true] %s292_s12 }
  0x16   : > { %p2821_p12 = pnand %p3231_p9, %p2341_p11  ;;  %p2493_p0 = scmp.ne.s32.totalorder %s306_s27, %s2492_s20 }
  0x17   : > { %p2500_p3 = scmp.lt.s32.totalorder %s306_s27, %s306_s27  ;;  %p2501_p4 = scmp.lt.s32.totalorder %s2492_s20, %s2492_s20 }
  0x18   : > { %p2827_p13 = pneg %p2821_p12 }
  0x19   : > { %p2502_p7 = por %p2501_p4, %p2500_p3 }
  0x1a   : > { %p2495_p1 = pnand %p2493_p0, %p2827_p13 }
  0x1c   : > { %p2496_p2 = pneg %p2495_p1 }
  0x1e   : > { %p2503_p8 = pnand %p2502_p7, %p2496_p2 }
  0x20   : > { %2506 = shalt.err (!%p2503_p8)
}
  0x21   : > { %s2688_s21 = smov 64   ;;  %s2689_s26 = smov 4  }
  0x22   : > { %s3241_s4 = sld [smem:[#allocation18_spill]]  ;;  %s2518_s22 = scalar_lea.vmem %s332_s30, 256 }
  0x23   : > { %p2519_p11 = scmp.ne.s32.totalorder %s332_s30, %s2518_s22  ;;  %p2526_p3 = scmp.lt.s32.totalorder %s332_s30, %s332_s30 }
  0x24   : > { %p2527_p2 = scmp.lt.s32.totalorder %s2518_s22, %s2518_s22 }
  0x25   : > { %p2521_p0 = pnand %p2519_p11, %p2827_p13 }
  0x26   : > { %p2528_p4 = por %p2527_p2, %p2526_p3 }
  0x27   : > { %p2522_p1 = pneg %p2521_p0 }
  0x28   : > { %2347 = dma.hbm_to_vmem [thread:$0]  (!%p2821_p12), %s3241_s4, 256, %s306_s27, [#allocation6], %s2688_s21, %s2688_s21, %s2689_s26  }
  0x29   : > { %p2529_p7 = pnand %p2528_p4, %p2522_p1 }
  0x2b   : > { %2532 = shalt.err (!%p2529_p7)
}
  0x2c   : > { %2353 = dma.hbm_to_vmem [thread:$0]  (!%p2821_p12), %s3225_s6, 256, %s332_s30, [#allocation9], %s2688_s21, %s2688_s21, %s2689_s26  }
  0x2d   : > { %s2544_s27 = scalar_lea.vmem %s293_s12, 256  ;;  %p2552_p9 = scmp.lt.s32.totalorder %s293_s12, %s293_s12 }
  0x2e   : > { %p2545_p8 = scmp.ne.s32.totalorder %s293_s12, %s2544_s27  ;;  %p2553_p3 = scmp.lt.s32.totalorder %s2544_s27, %s2544_s27 }
  0x30   : > { %p2547_p11 = pnand %p2545_p8, %p2827_p13  ;;  %p2554_p1 = por %p2553_p3, %p2552_p9 }
  0x32   : > { %p2548_p0 = pneg %p2547_p11 }
  0x34   : > { %p2555_p2 = pnand %p2554_p1, %p2548_p0 }
  0x36   : > { %2558 = shalt.err (!%p2555_p2)
}
  0x37   : > { %2344 = dma.hbm_to_vmem [thread:$0]  (!%p2821_p12), %s3222_s3, 256, %s293_s12, [#allocation3], %s2688_s21, %s2688_s21, %s2689_s26  }
  0x38   : > { %s2690_s30 = smov [#allocation7]   ;;  %s2691_s11 = smov [#allocation10]  }
  0x39   : > { %s318_s29 = sshll.u32 %s2690_s30, 4  ;;  %s344_s20 = sshll.u32 %s2691_s11, 4  ;;  %s319_s29 = int_to_ptr.vmem [resolvable:$true] %s318_s29  ;;  %s345_s20 = int_to_ptr.vmem [resolvable:$true] %s344_s20 }
  0x3a   : > { %s2570_s4 = scalar_lea.vmem %s319_s29, 256  ;;  %p2578_p8 = scmp.lt.s32.totalorder %s319_s29, %s319_s29 }
  0x3b   : > { %p2571_p4 = scmp.ne.s32.totalorder %s319_s29, %s2570_s4  ;;  %p2579_p11 = scmp.lt.s32.totalorder %s2570_s4, %s2570_s4 }
  0x3d   : > { %p2573_p9 = pnand %p2571_p4, %p2827_p13  ;;  %p2580_p0 = por %p2579_p11, %p2578_p8 }
  0x3f   : > { %p2574_p7 = pneg %p2573_p9 }
  0x41   : > { %p2581_p3 = pnand %p2580_p0, %p2574_p7 }
  0x43   : > { %2584 = shalt.err (!%p2581_p3)
}
  0x44   : > { %2350 = dma.hbm_to_vmem [thread:$0]  (!%p2821_p12), %s3224_s5, 256, %s319_s29, [#allocation6], %s2688_s21, %s2688_s21, %s2689_s26  }
  0x45   : > { %s2596_s22 = scalar_lea.vmem %s345_s20, 256  ;;  %p2604_p9 = scmp.lt.s32.totalorder %s345_s20, %s345_s20 }
  0x46   : > { %p2597_p1 = scmp.ne.s32.totalorder %s345_s20, %s2596_s22  ;;  %p2605_p8 = scmp.lt.s32.totalorder %s2596_s22, %s2596_s22 }
  0x48   : > { %p2599_p2 = pnand %p2597_p1, %p2827_p13  ;;  %p2606_p7 = por %p2605_p8, %p2604_p9 }
  0x4a   : > { %p2600_p4 = pneg %p2599_p2 }
  0x4c   : > { %p2607_p11 = pnand %p2606_p7, %p2600_p4 }
  0x4e   : > { %2610 = shalt.err (!%p2607_p11)
}
  0x4f   : > { %2356 = dma.hbm_to_vmem [thread:$0]  (!%p2821_p12), %s3226_s7, 256, %s345_s20, [#allocation9], %s2688_s21, %s2688_s21, %s2689_s26  }
  0x50   : > { %380 = sbr.rel (%p2813_p10) target bundleno = 4184 (0x1058), region = 60  ;;  %p3242_p13 = scmp.eq.s32.totalorder (!%p2813_p10), %s2785_s17, 0 }
  0x55   : > { %2654 = dma.done.wait (%p3242_p13), [#allocation3], 256   ;;  %p3243_p0 = pmov %p3242_p13 }
  0x57   : > { %2656 = vsyncadd (%p3243_p0), [#allocation3], 4294967040  ;;  %p3244_p3 = pmov %p3243_p0 }
  0x58   : > { %p3245_p1 = pmov %p3243_p0 }
  0x59   : > { %2658 = dma.done.wait (%p3244_p3), [#allocation6], 512  }
  0x5a   : > { %2660 = vsyncadd (%p3245_p1), [#allocation6], 4294966784  ;;  %p3246_p2 = pmov %p3243_p0 }
  0x5b   : > { %p3247_p12 = pmov %p3243_p0 }
  0x5c   : > { %2662 = dma.done.wait (%p3246_p2), [#allocation9], 512  }
  0x5d   : > { %2664 = vsyncadd (%p3247_p12), [#allocation9], 4294966784  ;;  %p437_p10 = scmp.lt.s32.totalorder %s2785_s17, 1  ;;  %v2692_v0 = vmov 0.0   ;;  %vm2693_vm0 = vmmov 0   ;;  %v2427_v1 = vld [vmem:[%s3221_s2 + $0x8] sm:$0xff]   ;;  %v455_v5 = vlaneseq }
  0x5e   : > { %2163 = vmatprep.subr.bf16.mxu1 %v2692_v0  ;;  %2167 = vmatprep.mubr.msk.bf16.mxu1 %vm2693_vm0, %v2692_v0  ;;  %v2428_v2 = vld [vmem:[%s3221_s2] sm:$0xff]   ;;  %vm471_vm1 = vcmask 261120   ;;  %s2694_s22 = smov 120   ;;  %s2695_s4 = smov 96   ;;  %vm528_vm2 = vcmask 64512   ;;  %vm593_vm4 = vcmask 1043456  }
  0x5f   : > { %s2900_s25 = scalar_select %p437_p10, %s2785_s17, 1  ;;  %2177 = vmatprep.subr.bf16.mxu0 %v2692_v0  ;;  %2179 = vmatprep.mubr.msk.bf16.mxu0 %vm2693_vm0, %v2692_v0  ;;  %v2926_v6 = vshrl.u32 %v455_v5, 7  ;;  %v2932_v8 = vld [vmem:[%s3228_s9] sm:$0xff]  ;;  %v522_v27 = vand.u32 127, %v455_v5  ;;  %vm983_vm5 = vcmask 130048   ;;  %vm985_vm6 = vcmask 195584  }
  0x60   : > { %2164 = vmatpush3.bf16.msra.mxu1 %v2427_v1  ;;  %s2696_s15 = smov 80   ;;  %s2697_s18 = smov 88   ;;  %vm1844_vm7 = vcmask 523264  }
  0x61   : > { %s2063_s28 = sshll.u32 %s2900_s25, 3  ;;  %2165 = vmatprep.subr.bf16.mxu1 %v2692_v0  ;;  %v457_v7 = vsub.s32 0, %v2926_v6  ;;  %s2698_s21 = smov 72   ;;  %vm523_vm3 = vcmp.le.s32.totalorder %v522_v27, %v2926_v6 }
  0x62   : > { %s440_s26 = scalar_lea.vmem %s3219_s0, %s2063_s28  ;;  %s2700_s30 = smov 104  }
  0x63   : > { %v2917_v3 = vld [vmem:[%s440_s26] sm:$0xff]  ;;  %v458_v9 = vrot.slane %v2932_v8, %v457_v7  ;;  %s2699_s26 = smov 112   ;;  %s2701_s29 = smov 56  }
  0x64   : > { %v454_v4 = vpack.c.bf16 %v2917_v3, %v2917_v3  ;;  %2166 = vmatpush3.bf16.msra.mxu1 %v2428_v2  ;;  %s2702_s11 = smov 64   ;;  %s2703_s20 = smov 40  }
  0x65   : > { %2171 = vmatprep.subr.bf16.mxu1 %v2692_v0  ;;  %s2704_s12 = smov 48   ;;  %s2705_s27 = smov 8  }
  0x66   : > { %s3248_s25 = smov 24  }
  0x67   : > { %2168 = vmatmul.mubr.msk.bf16.vlgmr.msra.gmra.mxu1 %vm471_vm1, %v454_v4 }
  0x68   : > { %2173 = vmatprep.mubr.msk.bf16.mxu1 %vm2693_vm0, %v2692_v0 }
 0x127   : > { %v509_v10 = vpop.f32.mrf.mxu1 }
 0x128   : > { %v510_v11 = vadd.f32 %v509_v10, %v458_v9 }
 0x129   : > { %v2169_v12 = vpop.f32.mrf.mxu1 }
 0x12a   : > { %v2937_v13 = vpack.c.bf16 %v510_v11, %v510_v11 }
 0x12b   : > { %v512_v14 = vpop.f32.mrf.mxu1 }
 0x12c   : > { %637 = vrot.lane.b32.xlu1 %v2937_v13, %s2694_s22  ;;  %526 = vrot.lane.b32.xlu0 %v2937_v13, %s2695_s4 }
 0x12d   : > { %v2170_v15 = vpop.f32.mrf.mxu1 }
 0x130   : > { %750 = vrot.lane.b32.xlu1 %v2937_v13, %s2696_s15  ;;  %639 = vrot.lane.b32.xlu0 %v2937_v13, %s2697_s18 }
 0x134   : > { %861 = vrot.lane.b32.xlu1 %v2937_v13, %s2698_s21  ;;  %748 = vrot.lane.b32.xlu0 %v2937_v13, %s2699_s26 }
 0x138   : > { %859 = vrot.lane.b32.xlu0 %v2937_v13, %s2700_s30 }
 0x19e   : > { %v527_v16 = vpop.permute.xlu0 %526  ;;  %v638_v19 = vpop.permute.xlu1 %637 }
 0x19f   : > { %v533_v17 = vsel %vm528_vm2, %v527_v16, 0 }
 0x1a0   : > { %2172 = vmatpush3.bf16.xpose.msra.mxu1 %v533_v17 }
 0x1a1   : > { %2183 = vmatprep.subr.bf16.mxu1 %v2692_v0 }
 0x1a2   : > { %v640_v18 = vpop.permute.xlu0 %639  ;;  %v751_v21 = vpop.permute.xlu1 %750 }
 0x1a3   : > { %v645_v20 = vsel %vm528_vm2, %v640_v18, 0  ;;  %v756_v22 = vsel %vm528_vm2, %v751_v21, 0 }
 0x1a6   : > { %v862_v23 = vpop.permute.xlu1 %861  ;;  %v749_v24 = vpop.permute.xlu0 %748 }
 0x1a7   : > { %2174 = vmatmul.mubr.msk.bf16.vlgmr.msra.gmra.mxu1 %vm528_vm2, %v2937_v13  ;;  %v867_v25 = vsel %vm528_vm2, %v862_v23, 0 }
 0x1a8   : > { %2184 = vmatpush3.bf16.xpose.msra.mxu1 %v645_v20  ;;  %2185 = vmatprep.mubr.msk.bf16.mxu1 %vm2693_vm0, %v2692_v0 }
 0x1a9   : > { %2195 = vmatprep.subr.bf16.mxu1 %v2692_v0 }
 0x1aa   : > { %v860_v26 = vpop.permute.xlu0 %859 }
 0x1af   : > { %2186 = vmatmul.mubr.msk.bf16.vlgmr.msra.gmra.mxu1 %vm528_vm2, %v638_v19 }
 0x1b0   : > { %2196 = vmatpush3.bf16.xpose.msra.mxu1 %v756_v22  ;;  %2197 = vmatprep.mubr.msk.bf16.mxu1 %vm2693_vm0, %v2692_v0 }
 0x1b1   : > { %2207 = vmatprep.subr.bf16.mxu1 %v2692_v0 }
 0x1b7   : > { %2198 = vmatmul.mubr.msk.bf16.vlgmr.msra.gmra.mxu1 %vm528_vm2, %v749_v24 }
 0x1b8   : > { %2208 = vmatpush3.bf16.xpose.msra.mxu1 %v867_v25  ;;  %2209 = vmatprep.mubr.msk.bf16.mxu1 %vm2693_vm0, %v2692_v0 }
 0x1b9   : > { %2219 = vmatprep.subr.bf16.mxu1 %v2692_v0 }
 0x1bf   : > { %2210 = vmatmul.mubr.msk.bf16.vlgmr.msra.gmra.mxu1 %vm528_vm2, %v860_v26 }
 0x1c0   : > { %2223 = vmatprep.mubr.msk.bf16.mxu1 %vm2693_vm0, %v2692_v0 }
 0x267   : > { %v569_v28 = vpop.f32.mrf.mxu1 }
 0x268   : > { %v575_v29 = vsel %vm523_vm3, %v569_v28, -1e+30 }
 0x269   : > { %v2175_v30 = vpop.f32.mrf.mxu1  ;;  %v576_v31 = vsel %vm528_vm2, %v575_v29, -inf }
 0x26a   : > { %577 = vmax.xlane.f32.xlu1 %v576_v31 }
 0x26b   : > { %v572_v32 = vpop.f32.mrf.mxu1 }
 0x26d   : > { %v2176_v33 = vpop.f32.mrf.mxu1 }
 0x26f   : > { %v681_v34 = vpop.f32.mrf.mxu1 }
 0x270   : > { %v687_v35 = vsel %vm523_vm3, %v681_v34, -1e+30 }
 0x271   : > { %v2187_v36 = vpop.f32.mrf.mxu1  ;;  %v688_v37 = vsel %vm528_vm2, %v687_v35, -inf }
 0x272   : > { %689 = vmax.xlane.f32.xlu0 %v688_v37 }
 0x273   : > { %v684_v38 = vpop.f32.mrf.mxu1 }
 0x275   : > { %v2188_v39 = vpop.f32.mrf.mxu1 }
 0x277   : > { %v792_v40 = vpop.f32.mrf.mxu1 }
 0x278   : > { %v798_v41 = vsel %vm523_vm3, %v792_v40, -1e+30 }
 0x279   : > { %v2199_v42 = vpop.f32.mrf.mxu1  ;;  %v799_v43 = vsel %vm528_vm2, %v798_v41, -inf }
 0x27a   : > { %800 = vmax.xlane.f32.xlu0 %v799_v43 }
 0x27b   : > { %v795_v44 = vpop.f32.mrf.mxu1 }
 0x27d   : > { %v2200_v45 = vpop.f32.mrf.mxu1 }
 0x27e   : > { %v2429_v45 = vld [vmem:[#allocation2 + $0x8] sm:$0xff]  }
 0x27f   : > { %v903_v46 = vpop.f32.mrf.mxu1  ;;  %2220 = vmatpush3.bf16.msra.mxu1 %v2429_v45 }
 0x280   : > { %v909_v47 = vsel %vm523_vm3, %v903_v46, -1e+30  ;;  %2221 = vmatprep.subr.bf16.mxu1 %v2692_v0  ;;  %v2430_v46 = vld [vmem:[#allocation2] sm:$0xff]  }
 0x281   : > { %v2211_v48 = vpop.f32.mrf.mxu1  ;;  %v910_v49 = vsel %vm528_vm2, %v909_v47, -inf }
 0x282   : > { %911 = vmax.xlane.f32.xlu1 %v910_v49 }
 0x283   : > { %v906_v50 = vpop.f32.mrf.mxu1  ;;  %2222 = vmatpush3.bf16.msra.mxu1 %v2430_v46 }
 0x284   : > { %2235 = vmatprep.subr.bf16.mxu1 %v2692_v0 }
 0x285   : > { %v2212_v51 = vpop.f32.mrf.mxu1 }
 0x2f3   : > { %v578_v52 = vpop.xlane.xlu1 %577 }
 0x2f4   : > { %v579_v53 = vsub.f32 %v575_v29, %v578_v52 }
 0x2f6   : > { %v580_v54 = vmul.f32 1.442695, %v579_v53 }
 0x2f8   : > { %2443 = vpow2.f32 %v580_v54 }
 0x2fb   : > { %v690_v55 = vpop.xlane.xlu0 %689 }
 0x2fc   : > { %v691_v56 = vsub.f32 %v687_v35, %v690_v55 }
 0x2fe   : > { %v692_v57 = vmul.f32 1.442695, %v691_v56 }
 0x300   : > { %2445 = vpow2.f32 %v692_v57 }
 0x303   : > { %v801_v58 = vpop.xlane.xlu0 %800 }
 0x304   : > { %v802_v59 = vsub.f32 %v798_v41, %v801_v58 }
 0x305   : > { %v2444_v60 = vpop.eup %2443 }
 0x306   : > { %v803_v61 = vmul.f32 1.442695, %v802_v59  ;;  %v582_v62 = vsel %vm528_vm2, %v2444_v60, 0.0 }
 0x307   : > { %583 = vadd.xlane.f32.xlu0 %v582_v62  ;;  %v990_v62 = vsub.s32 1, %v2926_v6 }
 0x308   : > { %2447 = vpow2.f32 %v803_v61 }
 0x30b   : > { %v912_v5 = vpop.xlane.xlu1 %911 }
 0x30c   : > { %v913_v9 = vsub.f32 %v909_v47, %v912_v5 }
 0x30d   : > { %v2446_v63 = vpop.eup %2445 }
 0x30e   : > { %v694_v1 = vsel %vm528_vm2, %v2446_v63, 0.0  ;;  %v914_v10 = vmul.f32 1.442695, %v913_v9 }
 0x30f   : > { %695 = vadd.xlane.f32.xlu1 %v694_v1 }
 0x310   : > { %2449 = vpow2.f32 %v914_v10 }
 0x315   : > { %v2448_v2 = vpop.eup %2447 }
 0x316   : > { %v805_v4 = vsel %vm528_vm2, %v2448_v2, 0.0 }
 0x317   : > { %806 = vadd.xlane.f32.xlu0 %v805_v4 }
 0x31d   : > { %v2450_v11 = vpop.eup %2449 }
 0x31e   : > { %v916_v12 = vsel %vm528_vm2, %v2450_v11, 0.0 }
 0x320   : > { %700 = vrot.lane.b32.xlu1 %v2937_v13, %s2701_s29  ;;  %s2706_s29 = smov 16  }
 0x32d   : > { %588 = vrot.lane.b32.xlu0 %v2937_v13, %s2702_s11  ;;  %s3232_s11 = smov 24  }
 0x331   : > { %922 = vrot.lane.b32.xlu0 %v2937_v13, %s2703_s20 }
 0x344   : > { %917 = vadd.xlane.f32.xlu1 %v916_v12 }
 0x355   : > { %811 = vrot.lane.b32.xlu1 %v2937_v13, %s2704_s12  ;;  %s2105_s12 = sshll.u32 %s2785_s17, 7 }
 0x390   : > { %v584_v14 = vpop.xlane.xlu0 %583 }
 0x391   : > { %2451 = vrcp.f32 %v584_v14 }
 0x398   : > { %v696_v15 = vpop.xlane.xlu1 %695 }
 0x399   : > { %2453 = vrcp.f32 %v696_v15 }
 0x39c   : > { %v701_v21 = vpop.permute.xlu1 %700 }
 0x39d   : > { %v706_v24 = vsel %vm593_vm4, %v701_v21, 0  ;;  %v2433_v21 = vld [vmem:[#allocation5 + $0x8] sm:$0xff]  }
 0x39e   : > { %v2452_v16 = vpop.eup %2451 }
 0x39f   : > { %v586_v18 = vmul.f32 %v2452_v16, %v2444_v60 }
 0x3a0   : > { %v807_v17 = vpop.xlane.xlu0 %806 }
 0x3a1   : > { %v587_v22 = vpack.c.bf16 %v586_v18, %v586_v18  ;;  %2455 = vrcp.f32 %v807_v17  ;;  %v2431_v18 = vld [vmem:[#allocation7 + $0x8] sm:$0xff]  }
 0x3a4   : > { %v589_v19 = vpop.permute.xlu0 %588 }
 0x3a5   : > { %v595_v20 = vsel %vm593_vm4, %v589_v19, 0 }
 0x3a6   : > { %2178 = vmatpush3.bf16.msra.mxu0 %v595_v20  ;;  %v2454_v23 = vpop.eup %2453 }
 0x3a7   : > { %2189 = vmatprep.subr.bf16.mxu0 %v2692_v0  ;;  %v698_v13 = vmul.f32 %v2454_v23, %v2446_v63  ;;  %v991_v63 = vrot.slane %v2932_v8, %v990_v62 }
 0x3a8   : > { %v923_v31 = vpop.permute.xlu0 %922 }
 0x3a9   : > { %2180 = vmatmul.mubr.msk.bf16.vlgmr.msra.gmra.mxu0 %vm528_vm2, %v587_v22  ;;  %v699_v25 = vpack.c.bf16 %v698_v13, %v698_v13  ;;  %v928_v33 = vsel %vm593_vm4, %v923_v31, 0  ;;  %v2434_v22 = vld [vmem:[#allocation5] sm:$0xff]  }
 0x3aa   : > { %2190 = vmatpush3.bf16.msra.mxu0 %v706_v24  ;;  %2191 = vmatprep.mubr.msk.bf16.mxu0 %vm2693_vm0, %v2692_v0 }
 0x3ab   : > { %2201 = vmatprep.subr.bf16.mxu0 %v2692_v0 }
 0x3ae   : > { %v2456_v26 = vpop.eup %2455 }
 0x3af   : > { %v809_v28 = vmul.f32 %v2456_v26, %v2448_v2  ;;  %v1069_v26 = vsub.s32 3, %v2926_v6 }
 0x3b1   : > { %2192 = vmatmul.mubr.msk.bf16.vlgmr.msra.gmra.mxu0 %vm528_vm2, %v699_v25  ;;  %v810_v32 = vpack.c.bf16 %v809_v28, %v809_v28  ;;  %v1064_v25 = vsub.s32 2, %v2926_v6 }
 0x3b2   : > { %2203 = vmatprep.mubr.msk.bf16.mxu0 %vm2693_vm0, %v2692_v0 }
 0x3cd   : > { %v918_v27 = vpop.xlane.xlu1 %917 }
 0x3ce   : > { %2457 = vrcp.f32 %v918_v27  ;;  %v1065_v27 = vrot.slane %v2932_v8, %v1064_v25 }
 0x3d1   : > { %v812_v29 = vpop.permute.xlu1 %811 }
 0x3d2   : > { %v817_v30 = vsel %vm593_vm4, %v812_v29, 0 }
 0x3d3   : > { %2202 = vmatpush3.bf16.msra.mxu0 %v817_v30  ;;  %v1070_v30 = vrot.slane %v2932_v8, %v1069_v26 }
 0x3d4   : > { %2213 = vmatprep.subr.bf16.mxu0 %v2692_v0 }
 0x3d6   : > { %2204 = vmatmul.mubr.msk.bf16.vlgmr.msra.gmra.mxu0 %vm528_vm2, %v810_v32 }
 0x3d7   : > { %2214 = vmatpush3.bf16.msra.mxu0 %v928_v33  ;;  %2215 = vmatprep.mubr.msk.bf16.mxu0 %vm2693_vm0, %v2692_v0 }
 0x3d8   : > { %2227 = vmatprep.subr.bf16.mxu0 %v2692_v0 }
 0x3db   : > { %v2458_v34 = vpop.eup %2457 }
 0x3dc   : > { %v920_v35 = vmul.f32 %v2458_v34, %v2450_v11  ;;  %v1143_v34 = vsub.s32 5, %v2926_v6 }
 0x3de   : > { %v921_v36 = vpack.c.bf16 %v920_v35, %v920_v35  ;;  %v1144_v35 = vrot.slane %v2932_v8, %v1143_v34 }
 0x3e0   : > { %2216 = vmatmul.mubr.msk.bf16.vlgmr.msra.gmra.mxu0 %vm528_vm2, %v921_v36 }
 0x3e1   : > { %2231 = vmatprep.mubr.msk.bf16.mxu0 %vm2693_vm0, %v2692_v0  ;;  %2228 = vmatpush3.bf16.msra.mxu0 %v2433_v21 }
 0x3e2   : > { %2229 = vmatprep.subr.bf16.mxu0 %v2692_v0 }
 0x3e5   : > { %2230 = vmatpush3.bf16.msra.mxu0 %v2434_v22 }
 0x3e6   : > { %2243 = vmatprep.subr.bf16.mxu0 %v2692_v0 }
 0x469   : > { %v631_v37 = vpop.f32.mrf.mxu0 }
 0x46b   : > { %v2181_v38 = vpop.f32.mrf.mxu0 }
 0x46d   : > { %v634_v39 = vpop.f32.mrf.mxu0 }
 0x46f   : > { %v2182_v40 = vpop.f32.mrf.mxu0 }
 0x471   : > { %v742_v41 = vpop.f32.mrf.mxu0 }
 0x472   : > { %971 = vrot.lane.b32.xlu1 %v742_v41, %s2705_s27 }
 0x473   : > { %v2193_v42 = vpop.f32.mrf.mxu0 }
 0x475   : > { %v745_v43 = vpop.f32.mrf.mxu0 }
 0x476   : > { %v1079_v43 = vsub.s32 4, %v2926_v6 }
 0x477   : > { %v2194_v44 = vpop.f32.mrf.mxu0 }
 0x478   : > { %v1080_v44 = vrot.slane %v2932_v8, %v1079_v43 }
 0x496   : > { %v853_v47 = vpop.f32.mrf.mxu0 }
 0x497   : > { %975 = vrot.lane.b32.xlu0 %v853_v47, %s2706_s29 }
 0x498   : > { %v2205_v48 = vpop.f32.mrf.mxu0 }
 0x49a   : > { %v856_v49 = vpop.f32.mrf.mxu0 }
 0x49c   : > { %v2206_v50 = vpop.f32.mrf.mxu0 }
 0x4a0   : > { %v964_v51 = vpop.f32.mrf.mxu0 }
 0x4a1   : > { %979 = vrot.lane.b32.xlu1 %v964_v51, %s3232_s11  ;;  %s444_s11 = scalar_lea.vmem %s3220_s1, %s2063_s28 }
 0x4a2   : > { %v2217_v52 = vpop.f32.mrf.mxu0  ;;  %v447_v19 = vld [vmem:[%s444_s11] sm:$0xff]  ;;  %s434_s11 = sand.u32 1, %s2675_s14  }
 0x4a3   : > { %v1140_v20 = vpack.c.bf16 %v447_v19, %v447_v19  ;;  %s2062_s20 = sshll.u32 %s434_s11, 3 }
 0x4a4   : > { %v967_v53 = vpop.f32.mrf.mxu0 }
 0x4a6   : > { %v2218_v54 = vpop.f32.mrf.mxu0 }
 0x4e4   : > { %v972_v55 = vpop.permute.xlu1 %971 }
 0x4e5   : > { %v982_v57 = vsel %vm528_vm2, %v631_v37, %v972_v55 }
 0x509   : > { %v976_v56 = vpop.permute.xlu0 %975 }
 0x50a   : > { %v984_v58 = vsel %vm983_vm5, %v982_v57, %v976_v56 }
 0x513   : > { %v980_v59 = vpop.permute.xlu1 %979 }
 0x514   : > { %v986_v60 = vsel %vm985_vm6, %v984_v58, %v980_v59 }
 0x515   : > { %v987_v61 = vpack.c.bf16 %v986_v60, %v986_v60 }
 0x517   : > { %2224 = vmatmul.mubr.msk.bf16.vlgmr.msra.gmra.mxu1 %vm471_vm1, %v987_v61 }
 0x518   : > { %2239 = vmatprep.mubr.msk.bf16.mxu1 %vm2693_vm0, %v2692_v0  ;;  %2236 = vmatpush3.bf16.msra.mxu1 %v2431_v18 }
 0x519   : > { %2237 = vmatprep.subr.bf16.mxu1 %v2692_v0 }
 0x5d7   : > { %v1041_v1 = vpop.f32.mrf.mxu1 }
 0x5d8   : > { %v1042_v2 = vadd.f32 %v1041_v1, %v991_v63 }
 0x5d9   : > { %v2225_v4 = vpop.f32.mrf.mxu1 }
 0x5da   : > { %v1047_v5 = vadd.f32 %v1042_v2, %v2917_v3  ;;  %v2432_v3 = vld [vmem:[#allocation7] sm:$0xff]  }
 0x5db   : > { %v1044_v9 = vpop.f32.mrf.mxu1  ;;  %2238 = vmatpush3.bf16.msra.mxu1 %v2432_v3 }
 0x5dc   : > { %v1048_v10 = vsel %vm471_vm1, %v1047_v5, 0.0  ;;  %2249 = vmatprep.subr.bf16.mxu1 %v2692_v0 }
 0x5dd   : > { %1049 = vadd.xlane.f32.xlu0 %v1048_v10  ;;  %v2226_v11 = vpop.f32.mrf.mxu1 }
 0x5de   : > { %2240 = vmatmul.mubr.msk.bf16.vlgmr.msra.gmra.mxu1 %vm471_vm1, %v1140_v20 }
 0x5df   : > { %2251 = vmatprep.mubr.msk.bf16.mxu1 %vm2693_vm0, %v2692_v0 }
 0x666   : > { %v1050_v12 = vpop.xlane.xlu0 %1049 }
 0x667   : > { %v1052_v14 = vmul.f32 0.03125, %v1050_v12 }
 0x669   : > { %v1053_v15 = vsub.f32 %v1047_v5, %v1052_v14 }
 0x66b   : > { %v1054_v16 = vmul.f32 %v1053_v15, %v1053_v15 }
 0x66d   : > { %v1055_v17 = vsel %vm471_vm1, %v1054_v16, 0.0 }
 0x66e   : > { %1056 = vadd.xlane.f32.xlu1 %v1055_v17 }
 0x69e   : > { %v1194_v36 = vpop.f32.mrf.mxu1 }
 0x69f   : > { %v1195_v37 = vadd.f32 %v1194_v36, %v1144_v35 }
 0x6a0   : > { %v2241_v38 = vpop.f32.mrf.mxu1 }
 0x6a1   : > { %v3062_v39 = vpack.c.bf16 %v1195_v37, %v1195_v37 }
 0x6a2   : > { %v1197_v40 = vpop.f32.mrf.mxu1 }
 0x6a3   : > { %1316 = vrot.lane.b32.xlu0 %v3062_v39, %s2694_s22  ;;  %v1210_v41 = vsel %vm528_vm2, %v3062_v39, 0 }
 0x6a4   : > { %v2242_v42 = vpop.f32.mrf.mxu1 }
 0x6a7   : > { %1426 = vrot.lane.b32.xlu0 %v3062_v39, %s2699_s26 }
 0x6ab   : > { %1536 = vrot.lane.b32.xlu0 %v3062_v39, %s2700_s30 }
 0x6f7   : > { %v1057_v23 = vpop.xlane.xlu1 %1056 }
 0x6f8   : > { %v1058_v24 = vmul.f32 0.03125, %v1057_v23 }
 0x6fa   : > { %v1059_v13 = vadd.f32 1e-05, %v1058_v24 }
 0x6fc   : > { %2459 = vrsqrt.f32 %v1059_v13 }
 0x709   : > { %v2460_v28 = vpop.eup %2459 }
 0x70a   : > { %v1061_v29 = vmul.f32 %v2460_v28, %v1053_v15 }
 0x70c   : > { %v1066_v31 = vmul.f32 %v1065_v27, %v1061_v29 }
 0x70e   : > { %v3053_v32 = vadd.f32 %v1070_v30, %v1066_v31 }
 0x710   : > { %v1076_v33 = vpack.c.bf16 %v3053_v32, %v3053_v32 }
 0x712   : > { %2232 = vmatmul.mubr.msk.bf16.vlgmr.msra.gmra.mxu0 %vm471_vm1, %v1076_v33 }
 0x713   : > { %2245 = vmatprep.mubr.msk.bf16.mxu0 %vm2693_vm0, %v2692_v0  ;;  %2244 = vmatpush3.bf16.xpose.msra.mxu0 %v1210_v41 }
 0x714   : > { %2255 = vmatprep.subr.bf16.mxu0 %v2692_v0 }
 0x715   : > { %v1317_v48 = vpop.permute.xlu0 %1316 }
 0x716   : > { %v1322_v50 = vsel %vm528_vm2, %v1317_v48, 0 }
 0x719   : > { %v1427_v53 = vpop.permute.xlu0 %1426 }
 0x71a   : > { %v1432_v55 = vsel %vm528_vm2, %v1427_v53, 0 }
 0x71d   : > { %v1537_v56 = vpop.permute.xlu0 %1536 }
 0x71e   : > { %v1542_v58 = vsel %vm528_vm2, %v1537_v56, 0 }
 0x7d2   : > { %v1130_v45 = vpop.f32.mrf.mxu0 }
 0x7d3   : > { %v1131_v46 = vadd.f32 %v1130_v45, %v1080_v44 }
 0x7d4   : > { %v2233_v47 = vpop.f32.mrf.mxu0 }
 0x7d5   : > { %v1204_v49 = vpack.c.bf16 %v1131_v46, %v1131_v46 }
 0x7d6   : > { %v1133_v51 = vpop.f32.mrf.mxu0 }
 0x7d7   : > { %1314 = vrot.lane.b32.xlu1 %v1204_v49, %s2694_s22  ;;  %2246 = vmatmul.mubr.msk.bf16.vlgmr.msra.gmra.mxu0 %vm528_vm2, %v1204_v49 }
 0x7d8   : > { %v2234_v52 = vpop.f32.mrf.mxu0  ;;  %2256 = vmatpush3.bf16.xpose.msra.mxu0 %v1322_v50  ;;  %2257 = vmatprep.mubr.msk.bf16.mxu0 %vm2693_vm0, %v2692_v0 }
 0x7d9   : > { %2267 = vmatprep.subr.bf16.mxu0 %v2692_v0 }
 0x7db   : > { %1424 = vrot.lane.b32.xlu1 %v1204_v49, %s2699_s26  ;;  %s2708_s26 = smov [#allocation11]  }
 0x7df   : > { %1534 = vrot.lane.b32.xlu1 %v1204_v49, %s2700_s30  ;;  %s2615_s30 = sshll.u32 %s2708_s26, 4  ;;  %s2616_s30 = int_to_ptr.vmem [resolvable:$false] %s2615_s30 }
 0x7e0   : > { %s2617_s17 = scalar_lea.vmem %s2616_s30, 256 }
 0x849   : > { %v1315_v54 = vpop.permute.xlu1 %1314 }
 0x84a   : > { %2258 = vmatmul.mubr.msk.bf16.vlgmr.msra.gmra.mxu0 %vm528_vm2, %v1315_v54 }
 0x84b   : > { %2268 = vmatpush3.bf16.xpose.msra.mxu0 %v1432_v55  ;;  %2269 = vmatprep.mubr.msk.bf16.mxu0 %vm2693_vm0, %v2692_v0 }
 0x84c   : > { %2279 = vmatprep.subr.bf16.mxu0 %v2692_v0 }
 0x84d   : > { %v1425_v57 = vpop.permute.xlu1 %1424 }
 0x851   : > { %v1535_v59 = vpop.permute.xlu1 %1534 }
 0x852   : > { %2270 = vmatmul.mubr.msk.bf16.vlgmr.msra.gmra.mxu0 %vm528_vm2, %v1425_v57 }
 0x853   : > { %2280 = vmatpush3.bf16.xpose.msra.mxu0 %v1542_v58  ;;  %2281 = vmatprep.mubr.msk.bf16.mxu0 %vm2693_vm0, %v2692_v0 }
 0x854   : > { %2291 = vmatprep.subr.bf16.mxu0 %v2692_v0 }
 0x85a   : > { %2282 = vmatmul.mubr.msk.bf16.vlgmr.msra.gmra.mxu0 %vm528_vm2, %v1535_v59 }
 0x85b   : > { %2295 = vmatprep.mubr.msk.bf16.mxu0 %vm2693_vm0, %v2692_v0 }
 0x897   : > { %v1246_v60 = vpop.f32.mrf.mxu0 }
 0x898   : > { %v1252_v61 = vsel %vm528_vm2, %v1246_v60, -inf }
 0x899   : > { %1253 = vmax.xlane.f32.xlu0 %v1252_v61  ;;  %v2247_v63 = vpop.f32.mrf.mxu0 }
 0x89b   : > { %v1249_v1 = vpop.f32.mrf.mxu0 }
 0x89d   : > { %v2248_v2 = vpop.f32.mrf.mxu0 }
 0x90a   : > { %v1358_v4 = vpop.f32.mrf.mxu0 }
 0x90b   : > { %v1364_v5 = vsel %vm528_vm2, %v1358_v4, -inf }
 0x90c   : > { %1365 = vmax.xlane.f32.xlu1 %v1364_v5  ;;  %v2259_v9 = vpop.f32.mrf.mxu0 }
 0x90e   : > { %v1361_v10 = vpop.f32.mrf.mxu0 }
 0x910   : > { %v2260_v11 = vpop.f32.mrf.mxu0 }
 0x912   : > { %v1468_v12 = vpop.f32.mrf.mxu0 }
 0x913   : > { %v1474_v14 = vsel %vm528_vm2, %v1468_v12, -inf }
 0x914   : > { %1475 = vmax.xlane.f32.xlu0 %v1474_v14  ;;  %v2271_v15 = vpop.f32.mrf.mxu0 }
 0x916   : > { %v1471_v16 = vpop.f32.mrf.mxu0 }
 0x917   : > { %v2435_v16 = vld [vmem:[#allocation8 + $0x8] sm:$0xff]  }
 0x918   : > { %v2272_v17 = vpop.f32.mrf.mxu0  ;;  %2292 = vmatpush3.bf16.msra.mxu0 %v2435_v16 }
 0x919   : > { %2293 = vmatprep.subr.bf16.mxu0 %v2692_v0 }
 0x91a   : > { %v1578_v18 = vpop.f32.mrf.mxu0 }
 0x91b   : > { %v1584_v3 = vsel %vm528_vm2, %v1578_v18, -inf }
 0x91c   : > { %1585 = vmax.xlane.f32.xlu0 %v1584_v3  ;;  %v2283_v19 = vpop.f32.mrf.mxu0  ;;  %v2436_v3 = vld [vmem:[#allocation8] sm:$0xff]  }
 0x91d   : > { %2294 = vmatpush3.bf16.msra.mxu0 %v2436_v3 }
 0x91e   : > { %v1581_v20 = vpop.f32.mrf.mxu0  ;;  %2307 = vmatprep.subr.bf16.mxu0 %v2692_v0 }
 0x920   : > { %v2284_v21 = vpop.f32.mrf.mxu0 }
 0x922   : > { %v1254_v22 = vpop.xlane.xlu0 %1253 }
 0x923   : > { %v1255_v23 = vsub.f32 %v1246_v60, %v1254_v22 }
 0x925   : > { %v1256_v24 = vmul.f32 1.442695, %v1255_v23 }
 0x927   : > { %2461 = vpow2.f32 %v1256_v24 }
 0x934   : > { %v2462_v13 = vpop.eup %2461 }
 0x935   : > { %v1258_v27 = vsel %vm528_vm2, %v2462_v13, 0.0 }
 0x936   : > { %1259 = vadd.xlane.f32.xlu1 %v1258_v27 }
 0x947   : > { %1265 = vrot.lane.b32.xlu1 %v3062_v39, %s2695_s4 }
 0x995   : > { %v1366_v28 = vpop.xlane.xlu1 %1365 }
 0x996   : > { %v1367_v29 = vsub.f32 %v1358_v4, %v1366_v28 }
 0x998   : > { %v1368_v30 = vmul.f32 1.442695, %v1367_v29 }
 0x99a   : > { %2463 = vpow2.f32 %v1368_v30 }
 0x99d   : > { %v1476_v31 = vpop.xlane.xlu0 %1475 }
 0x99e   : > { %v1477_v33 = vsub.f32 %v1468_v12, %v1476_v31 }
 0x9a0   : > { %v1478_v34 = vmul.f32 1.442695, %v1477_v33 }
 0x9a2   : > { %2465 = vpow2.f32 %v1478_v34 }
 0x9a5   : > { %v1586_v35 = vpop.xlane.xlu0 %1585 }
 0x9a6   : > { %v1587_v36 = vsub.f32 %v1578_v18, %v1586_v35 }
 0x9a7   : > { %v2464_v37 = vpop.eup %2463 }
 0x9a8   : > { %v1588_v38 = vmul.f32 1.442695, %v1587_v36  ;;  %v1370_v40 = vsel %vm528_vm2, %v2464_v37, 0.0 }
 0x9a9   : > { %1371 = vadd.xlane.f32.xlu0 %v1370_v40 }
 0x9aa   : > { %2467 = vpow2.f32 %v1588_v38  ;;  %v1662_v38 = vsub.s32 6, %v2926_v6 }
 0x9ac   : > { %v1663_v40 = vrot.slane %v2932_v8, %v1662_v38 }
 0x9af   : > { %v2466_v41 = vpop.eup %2465 }
 0x9b0   : > { %v1480_v42 = vsel %vm528_vm2, %v2466_v41, 0.0 }
 0x9b1   : > { %1481 = vadd.xlane.f32.xlu1 %v1480_v42 }
 0x9b7   : > { %v2468_v44 = vpop.eup %2467 }
 0x9b8   : > { %v1590_v45 = vsel %vm528_vm2, %v2468_v44, 0.0 }
 0x9b9   : > { %1591 = vadd.xlane.f32.xlu0 %v1590_v45 }
 0x9bf   : > { %v1260_v46 = vpop.xlane.xlu1 %1259 }
 0x9c0   : > { %2469 = vrcp.f32 %v1260_v46 }
 0x9c2   : > { %1486 = vrot.lane.b32.xlu1 %v3062_v39, %s2696_s15  ;;  %s1925_s15 = scalar_lea.hbm %s3229_s10, %s2105_s12 }
 0x9c3   : > { %v1266_v47 = vpop.permute.xlu1 %1265 }
 0x9c4   : > { %v1271_v48 = vsel %vm593_vm4, %v1266_v47, 0 }
 0x9c5   : > { %2250 = vmatpush3.bf16.msra.mxu1 %v1271_v48 }
 0x9c6   : > { %1596 = vrot.lane.b32.xlu1 %v3062_v39, %s2698_s21  ;;  %2261 = vmatprep.subr.bf16.mxu1 %v2692_v0 }
 0x9cd   : > { %v2470_v49 = vpop.eup %2469 }
 0x9ce   : > { %v1262_v50 = vmul.f32 %v2470_v49, %v2462_v13 }
 0x9cf   : > { %1376 = vrot.lane.b32.xlu0 %v3062_v39, %s2697_s18  ;;  %s1914_s18 = scalar_lea.sflag [#allocation4], %s434_s11 }
 0x9d0   : > { %v1263_v51 = vpack.c.bf16 %v1262_v50, %v1262_v50 }
 0x9d2   : > { %2252 = vmatmul.mubr.msk.bf16.vlgmr.msra.gmra.mxu1 %vm528_vm2, %v1263_v51 }
 0x9d3   : > { %2263 = vmatprep.mubr.msk.bf16.mxu1 %vm2693_vm0, %v2692_v0 }
 0xa32   : > { %v1372_v52 = vpop.xlane.xlu0 %1371 }
 0xa33   : > { %2471 = vrcp.f32 %v1372_v52 }
 0xa3a   : > { %v1482_v53 = vpop.xlane.xlu1 %1481 }
 0xa3b   : > { %2473 = vrcp.f32 %v1482_v53 }
 0xa3e   : > { %v1487_v59 = vpop.permute.xlu1 %1486 }
 0xa3f   : > { %v1492_v61 = vsel %vm593_vm4, %v1487_v59, 0 }
 0xa40   : > { %v2472_v54 = vpop.eup %2471 }
 0xa41   : > { %v1374_v56 = vmul.f32 %v2472_v54, %v2464_v37  ;;  %v2437_v54 = vld [vmem:[#allocation10 + $0x8] sm:$0xff]  }
 0xa42   : > { %v1592_v55 = vpop.xlane.xlu0 %1591  ;;  %v1597_v1 = vpop.permute.xlu1 %1596 }
 0xa43   : > { %2475 = vrcp.f32 %v1592_v55  ;;  %v1375_v39 = vpack.c.bf16 %v1374_v56, %v1374_v56  ;;  %v1602_v5 = vsel %vm593_vm4, %v1597_v1, 0  ;;  %v2438_v55 = vld [vmem:[#allocation10] sm:$0xff]   ;;  %v2440_v56 = vld [vmem:[%s3227_s8 + $0x10] sm:$0xff]  }
 0xa46   : > { %v1377_v57 = vpop.permute.xlu0 %1376 }
 0xa47   : > { %v1382_v58 = vsel %vm593_vm4, %v1377_v57, 0  ;;  %v2441_v57 = vld [vmem:[%s3227_s8 + $0x8] sm:$0xff]  }
 0xa48   : > { %2262 = vmatpush3.bf16.msra.mxu1 %v1382_v58  ;;  %v2474_v60 = vpop.eup %2473 }
 0xa49   : > { %2273 = vmatprep.subr.bf16.mxu1 %v2692_v0  ;;  %v1484_v63 = vmul.f32 %v2474_v60, %v2466_v41  ;;  %v1735_v60 = vsub.s32 7, %v2926_v6 }
 0xa4b   : > { %2264 = vmatmul.mubr.msk.bf16.vlgmr.msra.gmra.mxu1 %vm528_vm2, %v1375_v39  ;;  %v1485_v2 = vpack.c.bf16 %v1484_v63, %v1484_v63  ;;  %v1736_v63 = vrot.slane %v2932_v8, %v1735_v60 }
 0xa4c   : > { %2274 = vmatpush3.bf16.msra.mxu1 %v1492_v61  ;;  %2275 = vmatprep.mubr.msk.bf16.mxu1 %vm2693_vm0, %v2692_v0  ;;  %v449_v61 = vld [vmem:[%s3228_s9 + $0x8] sm:$0x1f] }
 0xa4d   : > { %2285 = vmatprep.subr.bf16.mxu1 %v2692_v0 }
 0xa50   : > { %v2476_v4 = vpop.eup %2475 }
 0xa51   : > { %v1594_v9 = vmul.f32 %v2476_v4, %v2468_v44 }
 0xa53   : > { %2276 = vmatmul.mubr.msk.bf16.vlgmr.msra.gmra.mxu1 %vm528_vm2, %v1485_v2  ;;  %v1595_v10 = vpack.c.bf16 %v1594_v9, %v1594_v9  ;;  %v1741_v2 = vrot.slane %v449_v61, %v457_v7 }
 0xa54   : > { %2286 = vmatpush3.bf16.msra.mxu1 %v1602_v5  ;;  %2287 = vmatprep.mubr.msk.bf16.mxu1 %vm2693_vm0, %v2692_v0 }
 0xa55   : > { %2299 = vmatprep.subr.bf16.mxu1 %v2692_v0 }
 0xa5b   : > { %2288 = vmatmul.mubr.msk.bf16.vlgmr.msra.gmra.mxu1 %vm528_vm2, %v1595_v10  ;;  %v2442_v10 = vld [vmem:[%s3227_s8] sm:$0xff]  }
 0xa5c   : > { %2303 = vmatprep.mubr.msk.bf16.mxu1 %vm2693_vm0, %v2692_v0  ;;  %2300 = vmatpush3.bf16.msra.mxu1 %v2437_v54 }
 0xa5d   : > { %2301 = vmatprep.subr.bf16.mxu1 %v2692_v0 }
 0xa60   : > { %2302 = vmatpush3.bf16.msra.mxu1 %v2438_v55 }
 0xa92   : > { %v1307_v11 = vpop.f32.mrf.mxu1 }
 0xa94   : > { %v2253_v12 = vpop.f32.mrf.mxu1 }
 0xa96   : > { %v1310_v14 = vpop.f32.mrf.mxu1 }
 0xa98   : > { %v2254_v15 = vpop.f32.mrf.mxu1 }
 0xb0b   : > { %v1418_v17 = vpop.f32.mrf.mxu1 }
 0xb0c   : > { %1645 = vrot.lane.b32.xlu0 %v1418_v17, %s2705_s27  ;;  %v1819_v17 = vrot.slane %v449_v61, %v1064_v25 }
 0xb0d   : > { %v2265_v18 = vpop.f32.mrf.mxu1 }
 0xb0f   : > { %v1421_v19 = vpop.f32.mrf.mxu1 }
 0xb11   : > { %v2266_v20 = vpop.f32.mrf.mxu1 }
 0xb13   : > { %v1528_v21 = vpop.f32.mrf.mxu1 }
 0xb14   : > { %1649 = vrot.lane.b32.xlu1 %v1528_v21, %s2706_s29 }
 0xb15   : > { %v2277_v22 = vpop.f32.mrf.mxu1 }
 0xb17   : > { %v1531_v23 = vpop.f32.mrf.mxu1 }
 0xb19   : > { %v2278_v24 = vpop.f32.mrf.mxu1 }
 0xb1b   : > { %v1638_v13 = vpop.f32.mrf.mxu1 }
 0xb1c   : > { %1653 = vrot.lane.b32.xlu0 %v1638_v13, %s3248_s25  ;;  %s436_s25 = scalar_lea.vmem [#allocation11], %s2062_s20 }
 0xb1d   : > { %v2289_v27 = vpop.f32.mrf.mxu1  ;;  %s1927_s28 = sshll.u32 %s436_s25, 4  ;;  %s1928_s28 = int_to_ptr.vmem [resolvable:$true] %s1927_s28 }
 0xb1e   : > { %s2611_s21 = scalar_lea.vmem %s1928_s28, 128  ;;  %p2618_p7 = scmp.lt.s32.totalorder %s1928_s28, %s2616_s30 }
 0xb1f   : > { %v1641_v28 = vpop.f32.mrf.mxu1  ;;  %p2612_p4 = scmp.ne.s32.totalorder %s1928_s28, %s2611_s21  ;;  %p2619_p11 = scmp.lt.s32.totalorder %s2617_s17, %s2611_s21 }
 0xb21   : > { %v2290_v29 = vpop.f32.mrf.mxu1  ;;  %p2613_p9 = pnand %p2612_p4, %p2802_p5  ;;  %p2620_p13 = por %p2619_p11, %p2618_p7 }
 0xb23   : > { %p2614_p8 = pneg %p2613_p9 }
 0xb25   : > { %p2621_p0 = pnand %p2620_p13, %p2614_p8 }
 0xb7e   : > { %v1646_v30 = vpop.permute.xlu0 %1645 }
 0xb7f   : > { %v1656_v33 = vsel %vm528_vm2, %v1307_v11, %v1646_v30  ;;  %v1751_v11 = vrot.slane %v449_v61, %v990_v62 }
 0xb86   : > { %v1650_v31 = vpop.permute.xlu1 %1649 }
 0xb87   : > { %v1657_v34 = vsel %vm983_vm5, %v1656_v33, %v1650_v31  ;;  %v1905_v31 = vrot.slane %v449_v61, %v1069_v26 }
 0xb8e   : > { %v1654_v35 = vpop.permute.xlu0 %1653 }
 0xb8f   : > { %v1658_v36 = vsel %vm985_vm6, %v1657_v34, %v1654_v35  ;;  %v1910_v34 = vrot.slane %v449_v61, %v1079_v43 }
 0xb90   : > { %v1659_v37 = vpack.c.bf16 %v1658_v36, %v1658_v36 }
 0xb92   : > { %2296 = vmatmul.mubr.msk.bf16.vlgmr.msra.gmra.mxu0 %vm471_vm1, %v1659_v37 }
 0xb93   : > { %2315 = vmatprep.mubr.msk.bf16.mxu0 %vm2693_vm0, %v2692_v0 }
 0xc52   : > { %v1713_v41 = vpop.f32.mrf.mxu0 }
 0xc53   : > { %v1714_v42 = vadd.f32 %v1713_v41, %v1663_v40 }
 0xc54   : > { %v2297_v44 = vpop.f32.mrf.mxu0 }
 0xc55   : > { %v1719_v45 = vadd.f32 %v1714_v42, %v3053_v32  ;;  %v2439_v32 = vld [vmem:[%s3227_s8 + $0x18] sm:$0xff]  }
 0xc56   : > { %v1716_v46 = vpop.f32.mrf.mxu0  ;;  %2308 = vmatpush3.bf16.msra.mxu0 %v2439_v32 }
 0xc57   : > { %v1720_v47 = vsel %vm471_vm1, %v1719_v45, 0.0  ;;  %2309 = vmatprep.subr.bf16.mxu0 %v2692_v0 }
 0xc58   : > { %1721 = vadd.xlane.f32.xlu1 %v1720_v47  ;;  %v2298_v48 = vpop.f32.mrf.mxu0 }
 0xc5a   : > { %2310 = vmatpush3.bf16.msra.mxu0 %v2440_v56 }
 0xc5b   : > { %2311 = vmatprep.subr.bf16.mxu0 %v2692_v0 }
 0xc5e   : > { %2312 = vmatpush3.bf16.msra.mxu0 %v2441_v57 }
 0xc5f   : > { %2313 = vmatprep.subr.bf16.mxu0 %v2692_v0 }
 0xc62   : > { %2314 = vmatpush3.bf16.msra.mxu0 %v2442_v10 }
 0xce1   : > { %v1722_v49 = vpop.xlane.xlu1 %1721 }
 0xce2   : > { %v1723_v50 = vmul.f32 0.03125, %v1722_v49 }
 0xce4   : > { %v1724_v51 = vsub.f32 %v1719_v45, %v1723_v50 }
 0xce6   : > { %v1725_v52 = vmul.f32 %v1724_v51, %v1724_v51 }
 0xce8   : > { %v1726_v53 = vsel %vm471_vm1, %v1725_v52, 0.0 }
 0xce9   : > { %1727 = vadd.xlane.f32.xlu0 %v1726_v53 }
 0xd72   : > { %v1728_v58 = vpop.xlane.xlu0 %1727 }
 0xd73   : > { %v1729_v59 = vmul.f32 0.03125, %v1728_v58 }
 0xd75   : > { %v1730_v39 = vadd.f32 1e-05, %v1729_v59 }
 0xd77   : > { %2477 = vrsqrt.f32 %v1730_v39 }
 0xd84   : > { %v2478_v1 = vpop.eup %2477 }
 0xd85   : > { %v1732_v4 = vmul.f32 %v2478_v1, %v1724_v51 }
 0xd87   : > { %v1737_v5 = vmul.f32 %v1736_v63, %v1732_v4 }
 0xd89   : > { %v1742_v9 = vadd.f32 %v1741_v2, %v1737_v5 }
 0xd8b   : > { %v1747_v0 = vpack.c.bf16 %v1742_v9, %v1742_v9 }
 0xd8d   : > { %2304 = vmatmul.mubr.msk.bf16.vlgmr.msra.gmra.mxu1 %vm471_vm1, %v1747_v0 }
 0xe4d   : > { %v1801_v12 = vpop.f32.mrf.mxu1 }
 0xe4e   : > { %v1802_v8 = vadd.f32 %v1801_v12, %v1751_v11 }
 0xe4f   : > { %v2305_v14 = vpop.f32.mrf.mxu1 }
 0xe50   : > { %v1815_v15 = vpack.c.bf16 %v1802_v8, %v1802_v8 }
 0xe51   : > { %v1804_v7 = vpop.f32.mrf.mxu1 }
 0xe52   : > { %2316 = vmatmul.mubr.msk.bf16.vlgmr.msra.gmra.mxu0 %vm1844_vm7, %v1815_v15 }
 0xe53   : > { %v2306_v16 = vpop.f32.mrf.mxu1 }
 0xf12   : > { %v1882_v18 = vpop.f32.mrf.mxu0 }
 0xf13   : > { %v1883_v3 = vadd.f32 %v1882_v18, %v1819_v17 }
 0xf14   : > { %v2317_v19 = vpop.f32.mrf.mxu0 }
 0xf15   : > { %v1888_v20 = vadd.f32 %v1883_v3, %v1742_v9 }
 0xf16   : > { %v1885_v21 = vpop.f32.mrf.mxu0 }
 0xf17   : > { %v1889_v22 = vsel %vm471_vm1, %v1888_v20, 0.0 }
 0xf18   : > { %1890 = vadd.xlane.f32.xlu0 %v1889_v22  ;;  %v2318_v62 = vpop.f32.mrf.mxu0 }
 0xfa1   : > { %v1891_v23 = vpop.xlane.xlu0 %1890 }
 0xfa2   : > { %v1892_v24 = vmul.f32 0.03125, %v1891_v23 }
 0xfa4   : > { %v1893_v13 = vsub.f32 %v1888_v20, %v1892_v24 }
 0xfa6   : > { %v1894_v27 = vmul.f32 %v1893_v13, %v1893_v13 }
 0xfa8   : > { %v1895_v28 = vsel %vm471_vm1, %v1894_v27, 0.0 }
 0xfa9   : > { %1896 = vadd.xlane.f32.xlu1 %v1895_v28 }
0x1032   : > { %v1897_v29 = vpop.xlane.xlu1 %1896 }
0x1033   : > { %v1898_v25 = vmul.f32 0.03125, %v1897_v29 }
0x1035   : > { %v1899_v30 = vadd.f32 1e-05, %v1898_v25 }
0x1037   : > { %2479 = vrsqrt.f32 %v1899_v30 }
0x1044   : > { %v2480_v33 = vpop.eup %2479 }
0x1045   : > { %v1901_v35 = vmul.f32 %v2480_v33, %v1893_v13 }
0x1047   : > { %v1906_v36 = vmul.f32 %v1905_v31, %v1901_v35 }
0x1049   : > { %v1911_v37 = vadd.f32 %v1910_v34, %v1906_v36 }
0x104b   : > { %1912 = vst.msk [vmem:[%s436_s25] sm:$0xff] %vm471_vm1, %v1911_v37 }
0x104c   : > { %2624 = shalt.err (!%p2621_p0)
}
0x104d   : > { %s2625_s27 = scalar_lea.hbm %s1925_s15, 128  ;;  %s2629_s20 = scalar_lea.hbm %s3229_s10, 256 }
0x104e   : > { %p2626_p3 = scmp.ne.s32.totalorder %s1925_s15, %s2625_s27  ;;  %p2630_p12 = scmp.lt.s32.totalorder %s1925_s15, %s3229_s10 }
0x104f   : > { %p2631_p10 = scmp.lt.s32.totalorder %s2629_s20, %s2625_s27 }
0x1050   : > { %p2627_p1 = pnand %p2626_p3, %p2802_p5 }
0x1051   : > { %p2632_p4 = por %p2631_p10, %p2630_p12 }
0x1052   : > { %p2628_p2 = pneg %p2627_p1 }
0x1054   : > { %p2633_p9 = pnand %p2632_p4, %p2628_p2 }
0x1056   : > { %2636 = shalt.err (!%p2633_p9)
}
0x1057   : > { %2339 = dma.vmem_to_hbm [thread:$0]  (%p2802_p5), %s1928_s28, 128, %s1925_s15, %s1914_s18  }
0x1058 PF: > { %p2371_p8 = scmp.ge.s32.totalorder %s2683_s16, 2  ;;  %s1939_s22 = sand.u32 1, %s2671_s13  }
0x1059   : > { %s1940_s4 = scalar_lea.sflag [#allocation4], %s1939_s22 }
0x105a   : > { %p2358_p7 = pnand %p2371_p8, %p2806_p6 }
0x105c   : > { %p2359_p11 = pneg %p2358_p7 }
0x105e   : > { %2666 = dma.done.wait (%p2359_p11), %s1940_s4, 128  }
0x105f   : > { %2668 = vsyncadd (%p2359_p11), %s1940_s4, 4294967168  ;;  %s3249_s21 = sld [smem:[#allocation16_spill]]  ;;  %p23_p13 = scmp.ge.s32.totalorder %s2789_s19, 4  }
0x1060   : > { %s3250_s15 = sld [smem:[#allocation17_spill]]  ;;  %s3251_s13 = smov %s2675_s14 }
0x1061   : > { %s3253_s16 = smov %s2789_s19  ;;  %25 = sbr.rel (!%p23_p13) target bundleno = 8 (0x8), region = 119 }
0x1065   : > { %s3252_s14 = smov %s3249_s21 }
0x1066   :  { %1945 = vsyncpa [#allocation3], 1 }
0x1067   :  { %1947 = vsyncpa [#allocation3 + $0x1], 1 }
0x1068   :  { %1948 = vsyncpa [#allocation6], 1 }
0x1069   :  { %1949 = vsyncpa [#allocation9], 1 }
0x106a   :  { %1950 = vsyncpa [#allocation4], 1 }
0x106b   :  { %1952 = vsyncpa [#allocation4 + $0x1], 1 }

</bundles_post_ra>
